<compile_context>
chip_gen: v6e
topology: v6e:2x2x1
jax: 0.10.0
libtpu: 0.0.40
codegen_flags: <defaults>
</compile_context>

<pallas_src>
import jax
import jax.numpy as jnp
from jax.experimental import pallas as pl
from jax.experimental.pallas import tpu as pltpu

EPS = 1e-5
VMEM_LIMIT = 32 * 1024 * 1024  # explicit scoped-VMEM budget (safe on v5e/v6e/v7x)


# ----------------------------- Pallas kernels ------------------------------ #
def _conv_kernel(a_ref, w_ref, o_ref, stats_ref, acc_ref):
    """One depth-tap contribution of the 3x3x3 conv for one (n, d) plane.

    a_ref:     (1, 1, HW, 9*Cin)   bf16  H/W-tap im2col of input depth slice d+kd
    w_ref:     (1, 9*Cin, Cp)      bf16  weights for depth tap kd (Cout padded to Cp)
    o_ref:     (1, 1, HW, Cp)      f32   conv output plane
    stats_ref: (1, 1, 2, Cp)       f32   per-plane [sum, sumsq] over rows (BN stats)
    acc_ref:   (HW, Cp)            f32   VMEM accumulator across the kd axis
    """
    kd = pl.program_id(2)

    @pl.when(kd == 0)
    def _():
        acc_ref[...] = jnp.zeros_like(acc_ref)

    a = a_ref[0, 0]          # (HW, 9*Cin) bf16
    w = w_ref[0]             # (9*Cin, Cp) bf16
    acc_ref[...] += jnp.dot(a, w, preferred_element_type=jnp.float32)

    @pl.when(kd == pl.num_programs(2) - 1)
    def _():
        acc = acc_ref[...]
        o_ref[0, 0] = acc.astype(o_ref.dtype)
        sums = jnp.sum(acc, axis=0, keepdims=True)            # (1, Cp)
        sqs = jnp.sum(acc * acc, axis=0, keepdims=True)       # (1, Cp)
        stats_ref[0, 0] = jnp.concatenate([sums, sqs], axis=0)  # (2, Cp)


def _bn_act_kernel(y_ref, s_ref, b_ref, o_ref):
    # y * scale + bias, ReLU   (scale/bias already fold mean/var/gamma/beta)
    y = y_ref[...].astype(jnp.float32)
    o_ref[...] = jnp.maximum(y * s_ref[...] + b_ref[...], 0.0).astype(o_ref.dtype)


def _bn_add_act_kernel(y_ref, r_ref, s_ref, b_ref, o_ref):
    # y * scale + bias + residual, ReLU
    y = y_ref[...].astype(jnp.float32)
    z = y * s_ref[...] + b_ref[...] + r_ref[...].astype(jnp.float32)
    o_ref[...] = jnp.maximum(z, 0.0).astype(o_ref.dtype)


# ---------------------------- pallas_call wrappers -------------------------- #
def _pick_tile(m, candidates=(512, 256, 128, 64, 32, 16, 8)):
    for t in candidates:
        if m % t == 0:
            return t
    return m  # fall back to the full dim (always legal as a block shape)


def conv3x3x3_bn_stats(cols9, w9, nb, nd, hw, cp):
    """Tiled conv-as-matmul with fused BN statistics.

    cols9: (nb, nd+2, hw, 9*Cin) bf16   (depth-padded, H/W-tap im2col)
    w9:    (3, 9*Cin, cp)        bf16
    returns y: (nb, nd, hw, cp) f32,  stats: (nb, nd, 2, cp) f32
    """
    k9 = cols9.shape[-1]
    flops = 2 * nb * nd * 3 * hw * k9 * cp
    bytes_accessed = (3 * nb * nd * hw * k9 * 2      # A streamed 3x (bf16)
                      + 3 * k9 * cp * 2              # weights (bf16)
                      + nb * nd * hw * cp * 4        # conv output (f32)
                      + nb * nd * 2 * cp * 4)        # stats (f32)
    return pl.pallas_call(
        _conv_kernel,
        grid=(nb, nd, 3),
        in_specs=[
            pl.BlockSpec((1, 1, hw, k9), lambda ni, di, kd: (ni, di + kd, 0, 0)),
            pl.BlockSpec((1, k9, cp), lambda ni, di, kd: (kd, 0, 0)),
        ],
        out_specs=(
            pl.BlockSpec((1, 1, hw, cp), lambda ni, di, kd: (ni, di, 0, 0)),
            pl.BlockSpec((1, 1, 2, cp), lambda ni, di, kd: (ni, di, 0, 0)),
        ),
        out_shape=(
            jax.ShapeDtypeStruct((nb, nd, hw, cp), jnp.float32),
            jax.ShapeDtypeStruct((nb, nd, 2, cp), jnp.float32),
        ),
        scratch_shapes=[pltpu.VMEM((hw, cp), jnp.float32)],
        compiler_params=pltpu.CompilerParams(
            dimension_semantics=("parallel", "parallel", "arbitrary"),
            vmem_limit_bytes=VMEM_LIMIT),
        cost_estimate=pl.CostEstimate(
            flops=flops, transcendentals=0, bytes_accessed=bytes_accessed),
    )(cols9, w9)


def scale_bias_act(y, scale, bias, out_dtype, residual=None):
    """Tiled, lane-dense  relu(y * scale + bias (+ residual))  over (M, Cp)."""
    M, Cp = y.shape
    tm = _pick_tile(M)

    in_specs = [pl.BlockSpec((tm, Cp), lambda i: (i, 0))]
    args = [y]
    if residual is not None:
        in_specs.append(pl.BlockSpec((tm, Cp), lambda i: (i, 0)))
        args.append(residual)
    in_specs += [pl.BlockSpec((1, Cp), lambda i: (0, 0)),
                 pl.BlockSpec((1, Cp), lambda i: (0, 0))]
    args += [scale.reshape(1, Cp), bias.reshape(1, Cp)]

    kernel = _bn_add_act_kernel if residual is not None else _bn_act_kernel
    return pl.pallas_call(
        kernel,
        grid=(M // tm,),
        in_specs=in_specs,
        out_specs=pl.BlockSpec((tm, Cp), lambda i: (i, 0)),
        out_shape=jax.ShapeDtypeStruct((M, Cp), out_dtype),
        compiler_params=pltpu.CompilerParams(
            dimension_semantics=("parallel",),
            vmem_limit_bytes=VMEM_LIMIT),
    )(*args)


# ------------------------------- glue (JAX) --------------------------------- #
@jax.jit
def basic_block_forward(x_ncdhw, w1, g1, b1, w2, g2, b2):
    """BasicBlock.forward with stride=1, down_sample=None (module defaults)."""
    N, C, D, H, W = x_ncdhw.shape
    Cp = ((C + 127) // 128) * 128          # lane-dense padded channel count
    HW = H * W
    M = N * D * HW

    x = jnp.transpose(x_ncdhw, (0, 2, 3, 4, 1))      # NCDHW -> NDHWC

    def im2col9(v_ndhwc):
        # 3x3 H/W taps only; depth taps handled by the conv grid index_map.
        Cin = v_ndhwc.shape[-1]
        vp = jnp.pad(v_ndhwc, ((0, 0), (1, 1), (1, 1), (1, 1), (0, 0)))
        taps = [vp[:, :, kh:kh + H, kw:kw + W, :]
                for kh in range(3) for kw in range(3)]
        col = jnp.stack(taps, axis=-2)               # (N, D+2, H, W, 9, Cin)
        return col.reshape(N, D + 2, HW, 9 * Cin).astype(jnp.bfloat16)

    def wcol(w_oidhw):
        # (Cout, Cin, 3, 3, 3) -> (3, 9*Cin, Cp), tap-major / Cin-minor, bf16.
        Cout, Cin = w_oidhw.shape[:2]
        wt = jnp.transpose(w_oidhw, (2, 3, 4, 1, 0)).reshape(3, 9 * Cin, Cout)
        wt = jnp.pad(wt, ((0, 0), (0, 0), (0, Cp - Cout)))
        return wt.astype(jnp.bfloat16)

    def pad_vec(v):
        return jnp.pad(v, (0, Cp - v.shape[0]))      # padded gamma/beta = 0

    def bn_coeffs(stats, gamma, beta):
        s = jnp.sum(stats, axis=(0, 1))              # (2, Cp) global sums
        mean = s[0] / M
        var = jnp.maximum(s[1] / M - mean * mean, 0.0)   # biased (training) var
        inv = jax.lax.rsqrt(var + EPS)
        scale = pad_vec(gamma) * inv
        bias = pad_vec(beta) - mean * scale
        return scale.astype(jnp.float32), bias.astype(jnp.float32)

    # conv1 (+ fused BN1 statistics), then bn1 + relu  (bf16 out feeds conv2 MXU)
    y1, st1 = conv3x3x3_bn_stats(im2col9(x), wcol(w1), N, D, HW, Cp)
    sc1, bi1 = bn_coeffs(st1, g1, b1)
    a1 = scale_bias_act(y1.reshape(M, Cp), sc1, bi1, jnp.bfloat16)

    # conv2 (+ fused BN2 statistics), then bn2 + residual + relu
    a1_ndhwc = a1[:, :C].reshape(N, D, H, W, C)
    y2, st2 = conv3x3x3_bn_stats(im2col9(a1_ndhwc), wcol(w2), N, D, HW, Cp)
    sc2, bi2 = bn_coeffs(st2, g2, b2)

    res = jnp.pad(x.reshape(M, C), ((0, 0), (0, Cp - C))).astype(jnp.float32)
    out = scale_bias_act(y2.reshape(M, Cp), sc2, bi2, jnp.float32, residual=res)

    out_ndhwc = out[:, :C].reshape(N, D, H, W, C)
    return jnp.transpose(out_ndhwc, (0, 4, 1, 2, 3))  # back to NCDHW


# ------------------------------ reference (JAX) ------------------------------ #
def _reference(x, w1, g1, b1, w2, g2, b2):
    def conv3d(v, w):
        return jax.lax.conv_general_dilated(
            v, w, window_strides=(1, 1, 1), padding=((1, 1),) * 3,
            dimension_numbers=("NCDHW", "OIDHW", "NCDHW"))

    def bn(v, g, b):
        mean = jnp.mean(v, axis=(0, 2, 3, 4), keepdims=True)
        var = jnp.mean((v - mean) ** 2, axis=(0, 2, 3, 4), keepdims=True)
        return ((v - mean) * jax.lax.rsqrt(var + EPS)
                * g.reshape(1, -1, 1, 1, 1) + b.reshape(1, -1, 1, 1, 1))

    out = jax.nn.relu(bn(conv3d(x, w1), g1, b1))
    out = bn(conv3d(out, w2), g2, b2)
    return jax.nn.relu(out + x)


if __name__ == "__main__":
    key = jax.random.PRNGKey(0)
    k = jax.random.split(key, 7)

    # in_planes == planes (required by the residual add when down_sample=None)
    Nb, C, D, H, W = 2, 8, 8, 8, 8
    x = jax.random.normal(k[0], (Nb, C, D, H, W), jnp.float32)

    fan_in = C * 3 * 3 * 3
    w1 = jax.random.normal(k[1], (C, C, 3, 3, 3), jnp.float32) * (2.0 / fan_in) ** 0.5
    w2 = jax.random.normal(k[2], (C, C, 3, 3, 3), jnp.float32) * (2.0 / fan_in) ** 0.5
    g1 = 1.0 + 0.1 * jax.random.normal(k[3], (C,), jnp.float32)
    b1 = 0.1 * jax.random.normal(k[4], (C,), jnp.float32)
    g2 = 1.0 + 0.1 * jax.random.normal(k[5], (C,), jnp.float32)
    b2 = 0.1 * jax.random.normal(k[6], (C,), jnp.float32)

    out = basic_block_forward(x, w1, g1, b1, w2, g2, b2)
    out = jax.block_until_ready(out)

    ref = _reference(x, w1, g1, b1, w2, g2, b2)
    assert out.shape == ref.shape == (Nb, C, D, H, W)
    max_err = float(jnp.max(jnp.abs(out - ref)))
    assert max_err < 3e-2, f"max abs error too large: {max_err}"

    print("KERNEL_OK")
</pallas_src>

<mosaic_0001>
module attributes {stable_mosaic.version = 11 : i64} {
  func.func @_conv_kernel(%arg0: i32, %arg1: i32, %arg2: i32, %arg3: memref<1x1x64x72xbf16, #tpu.memory_space<vmem>>, %arg4: memref<1x72x128xbf16, #tpu.memory_space<vmem>>, %arg5: memref<1x1x64x128xf32, #tpu.memory_space<vmem>>, %arg6: memref<1x1x2x128xf32, #tpu.memory_space<vmem>>, %arg7: memref<64x128xf32, #tpu.memory_space<vmem>>) attributes {dimension_semantics = [#tpu.dimension_semantics<parallel>, #tpu.dimension_semantics<parallel>, #tpu.dimension_semantics<arbitrary>], iteration_bounds = array<i64: 2, 8, 3>, scalar_prefetch = 0 : i64, scratch_operands = 1 : i64, tpu.core_type = #tpu.core_type<tc>, window_params = [{transform_indices = @transform_0, window_bounds = array<i64: 1, 1, 64, 72>}, {transform_indices = @transform_1, window_bounds = array<i64: 1, 72, 128>}, {transform_indices = @transform_2, window_bounds = array<i64: 1, 1, 64, 128>}, {transform_indices = @transform_3, window_bounds = array<i64: 1, 1, 2, 128>}]} {
    %c0_i32 = arith.constant 0 : i32
    %0 = arith.cmpi eq, %arg2, %c0_i32 : i32
    %1 = arith.extui %0 : i1 to i32
    %c0_i32_0 = arith.constant 0 : i32
    %2 = arith.cmpi ne, %1, %c0_i32_0 : i32
    scf.if %2 {
      %cst_12 = arith.constant 0.000000e+00 : f32
      %14 = vector.broadcast %cst_12 : f32 to vector<64x128xf32>
      %c0_13 = arith.constant 0 : index
      %c0_14 = arith.constant 0 : index
      %15 = vector.load %arg7[%c0_13, %c0_14] : memref<64x128xf32, #tpu.memory_space<vmem>>, vector<64x128xf32>
      tpu.vector_store %arg7[%c0_13, %c0_14], %14 {strides = array<i32>} : memref<64x128xf32, #tpu.memory_space<vmem>>, vector<64x128xf32>,
    } else {
    }
    %c0 = arith.constant 0 : index
    %c0_1 = arith.constant 0 : index
    %c0_2 = arith.constant 0 : index
    %c0_3 = arith.constant 0 : index
    %3 = vector.load %arg3[%c0, %c0_1, %c0_2, %c0_3] : memref<1x1x64x72xbf16, #tpu.memory_space<vmem>>, vector<1x1x64x72xbf16>
    %4 = vector.shape_cast %3 : vector<1x1x64x72xbf16> to vector<64x72xbf16>
    %c0_4 = arith.constant 0 : index
    %c0_5 = arith.constant 0 : index
    %c0_6 = arith.constant 0 : index
    %5 = vector.load %arg4[%c0_4, %c0_5, %c0_6] : memref<1x72x128xbf16, #tpu.memory_space<vmem>>, vector<1x72x128xbf16>
    %6 = vector.shape_cast %5 : vector<1x72x128xbf16> to vector<72x128xbf16>
    %c0_7 = arith.constant 0 : index
    %c0_8 = arith.constant 0 : index
    %7 = vector.load %arg7[%c0_7, %c0_8] : memref<64x128xf32, #tpu.memory_space<vmem>>, vector<64x128xf32>
    %cst = arith.constant dense<0.000000e+00> : vector<64x128xf32>
    %8 = tpu.matmul %4, %6, %cst {dimension_numbers = #tpu.dot_dimension_numbers<[1], [0], [0], [1], [0, 0, 1, 1], [], []>} : vector<64x72xbf16>, vector<72x128xbf16>, vector<64x128xf32> -> vector<64x128xf32>
    %9 = arith.addf %7, %8 : vector<64x128xf32>
    %c0_9 = arith.constant 0 : index
    %c0_10 = arith.constant 0 : index
    %10 = vector.load %arg7[%c0_9, %c0_10] : memref<64x128xf32, #tpu.memory_space<vmem>>, vector<64x128xf32>
    tpu.vector_store %arg7[%c0_9, %c0_10], %9 {strides = array<i32>} : memref<64x128xf32, #tpu.memory_space<vmem>>, vector<64x128xf32>,
    %c2_i32 = arith.constant 2 : i32
    %11 = arith.cmpi eq, %arg2, %c2_i32 : i32
    %12 = arith.extui %11 : i1 to i32
    %c0_i32_11 = arith.constant 0 : i32
    %13 = arith.cmpi ne, %12, %c0_i32_11 : i32
    scf.if %13 {
      %c0_12 = arith.constant 0 : index
      %c0_13 = arith.constant 0 : index
      %14 = vector.load %arg7[%c0_12, %c0_13] : memref<64x128xf32, #tpu.memory_space<vmem>>, vector<64x128xf32>
      %c0_14 = arith.constant 0 : index
      %c0_15 = arith.constant 0 : index
      %c0_16 = arith.constant 0 : index
      %c0_17 = arith.constant 0 : index
      %15 = vector.load %arg5[%c0_14, %c0_15, %c0_16, %c0_17] : memref<1x1x64x128xf32, #tpu.memory_space<vmem>>, vector<1x1x64x128xf32>
      %16 = vector.shape_cast %15 : vector<1x1x64x128xf32> to vector<64x128xf32>
      %17 = vector.shape_cast %14 : vector<64x128xf32> to vector<1x1x64x128xf32>
      tpu.vector_store %arg5[%c0_14, %c0_15, %c0_16, %c0_17], %17 {strides = array<i32>} : memref<1x1x64x128xf32, #tpu.memory_space<vmem>>, vector<1x1x64x128xf32>,
      %cst_18 = arith.constant dense<0.000000e+00> : vector<128xf32>
      %18 = vector.multi_reduction <add>, %14, %cst_18 [0] : vector<64x128xf32> to vector<128xf32>
      %19 = vector.shape_cast %18 : vector<128xf32> to vector<1x128xf32>
      %20 = arith.mulf %14, %14 : vector<64x128xf32>
      %cst_19 = arith.constant dense<0.000000e+00> : vector<128xf32>
      %21 = vector.multi_reduction <add>, %20, %cst_19 [0] : vector<64x128xf32> to vector<128xf32>
      %22 = vector.shape_cast %21 : vector<128xf32> to vector<1x128xf32>
      %23 = tpu.concatenate %19, %22 in 0 : vector<1x128xf32>, vector<1x128xf32> -> vector<2x128xf32>
      %c0_20 = arith.constant 0 : index
      %c0_21 = arith.constant 0 : index
      %c0_22 = arith.constant 0 : index
      %c0_23 = arith.constant 0 : index
      %24 = vector.load %arg6[%c0_20, %c0_21, %c0_22, %c0_23] : memref<1x1x2x128xf32, #tpu.memory_space<vmem>>, vector<1x1x2x128xf32>
      %25 = vector.shape_cast %24 : vector<1x1x2x128xf32> to vector<2x128xf32>
      %26 = vector.shape_cast %23 : vector<2x128xf32> to vector<1x1x2x128xf32>
      tpu.vector_store %arg6[%c0_20, %c0_21, %c0_22, %c0_23], %26 {strides = array<i32>} : memref<1x1x2x128xf32, #tpu.memory_space<vmem>>, vector<1x1x2x128xf32>,
    } else {
    }
    return
  }
  func.func @transform_0(%arg0: i32, %arg1: i32, %arg2: i32) -> (i32, i32, i32, i32) {
    %0 = arith.addi %arg1, %arg2 : i32
    %c0_i32 = arith.constant 0 : i32
    %c0_i32_0 = arith.constant 0 : i32
    %c0_i32_1 = arith.constant 0 : i32
    return %arg0, %0, %c0_i32, %c0_i32_0 : i32, i32, i32, i32
  }
  func.func @transform_1(%arg0: i32, %arg1: i32, %arg2: i32) -> (i32, i32, i32) {
    %c0_i32 = arith.constant 0 : i32
    %c0_i32_0 = arith.constant 0 : i32
    %c0_i32_1 = arith.constant 0 : i32
    return %arg2, %c0_i32, %c0_i32_0 : i32, i32, i32
  }
  func.func @transform_2(%arg0: i32, %arg1: i32, %arg2: i32) -> (i32, i32, i32, i32) {
    %c0_i32 = arith.constant 0 : i32
    %c0_i32_0 = arith.constant 0 : i32
    %c0_i32_1 = arith.constant 0 : i32
    return %arg0, %arg1, %c0_i32, %c0_i32_0 : i32, i32, i32, i32
  }
  func.func @transform_3(%arg0: i32, %arg1: i32, %arg2: i32) -> (i32, i32, i32, i32) {
    %c0_i32 = arith.constant 0 : i32
    %c0_i32_0 = arith.constant 0 : i32
    %c0_i32_1 = arith.constant 0 : i32
    return %arg0, %arg1, %c0_i32, %c0_i32_0 : i32, i32, i32, i32
  }
}

module attributes {stable_mosaic.version = 11 : i64} {
  func.func @_bn_act_kernel(%arg0: i32, %arg1: memref<512x128xf32, #tpu.memory_space<vmem>>, %arg2: memref<1x128xf32, #tpu.memory_space<vmem>>, %arg3: memref<1x128xf32, #tpu.memory_space<vmem>>, %arg4: memref<512x128xbf16, #tpu.memory_space<vmem>>) attributes {dimension_semantics = [#tpu.dimension_semantics<parallel>], iteration_bounds = array<i64: 2>, scalar_prefetch = 0 : i64, scratch_operands = 0 : i64, tpu.core_type = #tpu.core_type<tc>, window_params = [{transform_indices = @transform_0, window_bounds = array<i64: 512, 128>}, {pipeline_mode = #tpu.pipeline_mode<synchronous>, transform_indices = @transform_1, window_bounds = array<i64: 1, 128>}, {pipeline_mode = #tpu.pipeline_mode<synchronous>, transform_indices = @transform_2, window_bounds = array<i64: 1, 128>}, {transform_indices = @transform_3, window_bounds = array<i64: 512, 128>}]} {
    %c0 = arith.constant 0 : index
    %c0_0 = arith.constant 0 : index
    %0 = vector.load %arg1[%c0, %c0_0] : memref<512x128xf32, #tpu.memory_space<vmem>>, vector<512x128xf32>
    %c0_1 = arith.constant 0 : index
    %c0_2 = arith.constant 0 : index
    %1 = vector.load %arg2[%c0_1, %c0_2] : memref<1x128xf32, #tpu.memory_space<vmem>>, vector<1x128xf32>
    %2 = vector.broadcast %1 : vector<1x128xf32> to vector<512x128xf32>
    %3 = arith.mulf %0, %2 : vector<512x128xf32>
    %c0_3 = arith.constant 0 : index
    %c0_4 = arith.constant 0 : index
    %4 = vector.load %arg3[%c0_3, %c0_4] : memref<1x128xf32, #tpu.memory_space<vmem>>, vector<1x128xf32>
    %5 = vector.broadcast %4 : vector<1x128xf32> to vector<512x128xf32>
    %6 = arith.addf %3, %5 : vector<512x128xf32>
    %cst = arith.constant 0.000000e+00 : f32
    %7 = vector.broadcast %cst : f32 to vector<512x128xf32>
    %8 = arith.maximumf %6, %7 : vector<512x128xf32>
    %9 = arith.truncf %8 : vector<512x128xf32> to vector<512x128xbf16>
    %c0_5 = arith.constant 0 : index
    %c0_6 = arith.constant 0 : index
    %10 = vector.load %arg4[%c0_5, %c0_6] : memref<512x128xbf16, #tpu.memory_space<vmem>>, vector<512x128xbf16>
    tpu.vector_store %arg4[%c0_5, %c0_6], %9 {strides = array<i32>} : memref<512x128xbf16, #tpu.memory_space<vmem>>, vector<512x128xbf16>,
    return
  }
  func.func @transform_0(%arg0: i32) -> (i32, i32) {
    %c0_i32 = arith.constant 0 : i32
    %c0_i32_0 = arith.constant 0 : i32
    return %arg0, %c0_i32 : i32, i32
  }
  func.func @transform_1(%arg0: i32) -> (i32, i32) {
    %c0_i32 = arith.constant 0 : i32
    %c0_i32_0 = arith.constant 0 : i32
    %c0_i32_1 = arith.constant 0 : i32
    return %c0_i32, %c0_i32_0 : i32, i32
  }
  func.func @transform_2(%arg0: i32) -> (i32, i32) {
    %c0_i32 = arith.constant 0 : i32
    %c0_i32_0 = arith.constant 0 : i32
    %c0_i32_1 = arith.constant 0 : i32
    return %c0_i32, %c0_i32_0 : i32, i32
  }
  func.func @transform_3(%arg0: i32) -> (i32, i32) {
    %c0_i32 = arith.constant 0 : i32
    %c0_i32_0 = arith.constant 0 : i32
    return %arg0, %c0_i32 : i32, i32
  }
}

module attributes {stable_mosaic.version = 11 : i64} {
  func.func @_bn_add_act_kernel(%arg0: i32, %arg1: memref<512x128xf32, #tpu.memory_space<vmem>>, %arg2: memref<512x128xf32, #tpu.memory_space<vmem>>, %arg3: memref<1x128xf32, #tpu.memory_space<vmem>>, %arg4: memref<1x128xf32, #tpu.memory_space<vmem>>, %arg5: memref<512x128xf32, #tpu.memory_space<vmem>>) attributes {dimension_semantics = [#tpu.dimension_semantics<parallel>], iteration_bounds = array<i64: 2>, scalar_prefetch = 0 : i64, scratch_operands = 0 : i64, tpu.core_type = #tpu.core_type<tc>, window_params = [{transform_indices = @transform_0, window_bounds = array<i64: 512, 128>}, {transform_indices = @transform_1, window_bounds = array<i64: 512, 128>}, {pipeline_mode = #tpu.pipeline_mode<synchronous>, transform_indices = @transform_2, window_bounds = array<i64: 1, 128>}, {pipeline_mode = #tpu.pipeline_mode<synchronous>, transform_indices = @transform_3, window_bounds = array<i64: 1, 128>}, {transform_indices = @transform_4, window_bounds = array<i64: 512, 128>}]} {
    %c0 = arith.constant 0 : index
    %c0_0 = arith.constant 0 : index
    %0 = vector.load %arg1[%c0, %c0_0] : memref<512x128xf32, #tpu.memory_space<vmem>>, vector<512x128xf32>
    %c0_1 = arith.constant 0 : index
    %c0_2 = arith.constant 0 : index
    %1 = vector.load %arg3[%c0_1, %c0_2] : memref<1x128xf32, #tpu.memory_space<vmem>>, vector<1x128xf32>
    %2 = vector.broadcast %1 : vector<1x128xf32> to vector<512x128xf32>
    %3 = arith.mulf %0, %2 : vector<512x128xf32>
    %c0_3 = arith.constant 0 : index
    %c0_4 = arith.constant 0 : index
    %4 = vector.load %arg4[%c0_3, %c0_4] : memref<1x128xf32, #tpu.memory_space<vmem>>, vector<1x128xf32>
    %5 = vector.broadcast %4 : vector<1x128xf32> to vector<512x128xf32>
    %6 = arith.addf %3, %5 : vector<512x128xf32>
    %c0_5 = arith.constant 0 : index
    %c0_6 = arith.constant 0 : index
    %7 = vector.load %arg2[%c0_5, %c0_6] : memref<512x128xf32, #tpu.memory_space<vmem>>, vector<512x128xf32>
    %8 = arith.addf %6, %7 : vector<512x128xf32>
    %cst = arith.constant 0.000000e+00 : f32
    %9 = vector.broadcast %cst : f32 to vector<512x128xf32>
    %10 = arith.maximumf %8, %9 : vector<512x128xf32>
    %c0_7 = arith.constant 0 : index
    %c0_8 = arith.constant 0 : index
    %11 = vector.load %arg5[%c0_7, %c0_8] : memref<512x128xf32, #tpu.memory_space<vmem>>, vector<512x128xf32>
    tpu.vector_store %arg5[%c0_7, %c0_8], %10 {strides = array<i32>} : memref<512x128xf32, #tpu.memory_space<vmem>>, vector<512x128xf32>,
    return
  }
  func.func @transform_0(%arg0: i32) -> (i32, i32) {
    %c0_i32 = arith.constant 0 : i32
    %c0_i32_0 = arith.constant 0 : i32
    return %arg0, %c0_i32 : i32, i32
  }
  func.func @transform_1(%arg0: i32) -> (i32, i32) {
    %c0_i32 = arith.constant 0 : i32
    %c0_i32_0 = arith.constant 0 : i32
    return %arg0, %c0_i32 : i32, i32
  }
  func.func @transform_2(%arg0: i32) -> (i32, i32) {
    %c0_i32 = arith.constant 0 : i32
    %c0_i32_0 = arith.constant 0 : i32
    %c0_i32_1 = arith.constant 0 : i32
    return %c0_i32, %c0_i32_0 : i32, i32
  }
  func.func @transform_3(%arg0: i32) -> (i32, i32) {
    %c0_i32 = arith.constant 0 : i32
    %c0_i32_0 = arith.constant 0 : i32
    %c0_i32_1 = arith.constant 0 : i32
    return %c0_i32, %c0_i32_0 : i32, i32
  }
  func.func @transform_4(%arg0: i32) -> (i32, i32) {
    %c0_i32 = arith.constant 0 : i32
    %c0_i32_0 = arith.constant 0 : i32
    return %arg0, %c0_i32 : i32, i32
  }
}

</mosaic_0001>

<bundles_post_ra>
// kernel: basic_block_forward.4
= control target key start
LH: loop header
LB: loop body
LE: loop exit
PB: predicated region body
PF: predicated region fallthrough
CT: control target
= control target key end

     0   :  { %s876_s12 = smov 0   ;;  %s878_s13 = smov 0   ;;  %s993_s0 = inlined_call_operand.vmem [shape: bf16[2,10,64,72], index: 0, kind: input, shape index: {}]   ;;  %s994_s1 = inlined_call_operand.vmem [shape: bf16[3,72,128], index: 1, kind: input, shape index: {}]   ;;  %s995_s2 = inlined_call_operand.vmem [shape: f32[2,8,64,128], index: 2, kind: output, shape index: {0}]   ;;  %s996_s3 = inlined_call_operand.vmem [shape: f32[2,8,2,128], index: 3, kind: output, shape index: {1}]  }
   0x1   :  { %s880_s14 = smov 0   ;;  %s882_s15 = smov 0  }
   0x2   :  { %s884_s16 = smov 0   ;;  %s886_s17 = smov 0  }
   0x3   :  { %s888_s18 = smov 0  }
   0x4 LB: > { %s26_s19 = sadd.s32 1, %s841_s15  ;;  %s29_s20 = sadd.s32 1, %s845_s16  ;;  %s853_s18 = sphi %s888_s18, %s14_s18   ;;  %s849_s17 = sphi %s886_s17, %s1004_s17   ;;  %s845_s16 = sphi %s884_s16, %s1003_s16   ;;  %s841_s15 = sphi %s882_s15, %s1002_s15   ;;  %s837_s14 = sphi %s880_s14, %s1001_s14   ;;  %s833_s13 = sphi %s878_s13, %s1000_s13   ;;  %s829_s12 = sphi %s876_s12, %s999_s12  }
   0x5   : > { %p27_p0 = scmp.ge.s32.totalorder %s26_s19, 3  ;;  %p666_p1 = scmp.ge.s32.totalorder %s853_s18, 1 }
   0x6   : > { %p183_p2 = scmp.lt.s32.totalorder %s853_s18, 49  ;;  %s33_s21 = sadd.s32 1, %s849_s17 }
   0x7   : > { %s1006_s19 = smov (%p27_p0, %s26_s19), 0  ;;  %s1008_s20 = smov (!%p27_p0, %s29_s20), %s845_s16 }
   0x8   : > { %p184_p3 = pnand %p666_p1, %p183_p2  ;;  %p31_p4 = scmp.ge.s32.totalorder %s1008_s20, 8 }
   0x9   : > { %s229_s22 = sadd.s32 (!%p184_p3), %s829_s12, %s833_s13  ;;  %p230_p6 = scmp.lt.s32.totalorder (!%p184_p3), %s837_s14, 1 }
   0xa   : > { %s1010_s20 = smov (%p31_p4, %s1008_s20), 0  ;;  %s1012_s21 = smov (!%p31_p4, %s33_s21), %s849_s17 }
   0xb   : > { %p35_p5 = scmp.ge.s32.totalorder %s1012_s21, 2  ;;  %187 = sbr.rel (%p184_p3) target bundleno = 296 (0x128), region = 28 }
   0xc   : > { %p232_p7 = scmp.lt.s32.totalorder (!%p184_p3), %s229_s22, 9  ;;  %p240_p8 = scmp.lt.s32.totalorder (!%p184_p3), %s829_s12, 2 }
   0xd   : > { %s1014_s21 = smov (%p35_p5, %s1012_s21), 0  ;;  %p247_p9 = scmp.lt.s32.totalorder (!%p184_p3), %s833_s13, 7 }
   0xe   : > { %997 = sst [smem:[#allocation3_spill]] %s1014_s21  ;;  %p675_p10 = scmp.ne.s32.totalorder (!%p184_p3), %s829_s12, 0 }
  0x10   : > { %s1016_s14 = smov (!%p230_p6, %s837_s14), 1  ;;  %s1018_s22 = smov (!%p232_p7, %s229_s22), 9 }
  0x11   : > { %s731_s23 = smul.u32 80, %s1016_s14  ;;  %s667_s24 = sshll.u32 %s1018_s22, 3 }
  0x12   : > { %s671_s27 = sshll.u32 %s1016_s14, 6  ;;  %s673_s4 = sshll.u32 %s1016_s14, 3 }
  0x13   : > { %s236_s25 = sadd.s32 %s731_s23, %s667_s24  ;;  %s1020_s13 = smov (!%p247_p9, %s833_s13), 7 }
  0x14   : > { %s668_s26 = sshll.u32 %s236_s25, 2  ;;  %s670_s7 = sshll.u32 %s1020_s13, 3 }
  0x15   : > { %s929_s30 = scalar_lea.vmem %s993_s0, %s668_s26  ;;  %s259_s8 = sadd.s32 %s673_s4, %s1020_s13 }
  0x16   : > { %s241_s5 = scalar_select %p240_p8, %s829_s12, 2 }
  0x17   : > { %s251_s22 = sadd.s32 %s671_s27, %s670_s7  ;;  %s674_s24 = sshll.u32 %s259_s8, 1 }
  0x18   : > { %s732_s6 = smul.u32 36, %s241_s5  ;;  %s672_s23 = sshll.u32 %s251_s22, 3 }
  0x19   : > { %s941_s28 = scalar_lea.vmem %s995_s2, %s672_s23  ;;  %s946_s29 = scalar_lea.vmem %s996_s3, %s674_s24 }
  0x1a   : > { %s936_s11 = scalar_lea.vmem %s994_s1, %s732_s6  ;;  %266 = sbr.rel (%p675_p10) target bundleno = 36 (0x24), region = 32 }
  0x1f   : > { %v855_v0 = vmov 0.0  }
  0x20   : > { %267 = vst [vmem:[#allocation2 + $0x30] sm:$0xff] %v855_v0  ;;  %268 = vst [vmem:[#allocation2] sm:$0xff] %v855_v0 }
  0x21   : > { %269 = vst [vmem:[#allocation2 + $0x18] sm:$0xff] %v855_v0  ;;  %270 = vst [vmem:[#allocation2 + $0x10] sm:$0xff] %v855_v0 }
  0x22   : > { %271 = vst [vmem:[#allocation2 + $0x8] sm:$0xff] %v855_v0  ;;  %272 = vst [vmem:[#allocation2 + $0x20] sm:$0xff] %v855_v0 }
  0x23   : > { %273 = vst [vmem:[#allocation2 + $0x28] sm:$0xff] %v855_v0  ;;  %274 = vst [vmem:[#allocation2 + $0x38] sm:$0xff] %v855_v0 }
  0x24 PF: > { %v790_v1 = vld [vmem:[%s936_s11 + $0x20] ss:$0 sps:$4 sm:$0xff]   ;;  %vm360_vm0 = vcmask 1043456   ;;  %v791_v2 = vld [vmem:[%s936_s11 + $0x18] sm:$0xff]   ;;  %v792_v4 = vld [vmem:[%s936_s11 + $0x10] sm:$0xff]   ;;  %vm347_vm1 = vcmask 588800  }
  0x25   : > { %729 = vmatprep.subr.msk.bf16.mxu0 %vm360_vm0, %v790_v1  ;;  %730 = vmatprep.subr.msk.bf16.mxu1 %vm360_vm0, %v790_v1  ;;  %v362_v3 = vsel %vm360_vm0, %v790_v1, 0  ;;  %v795_v5 = vld [vmem:[%s929_s30] sm:$0xff]   ;;  %v796_v6 = vld [vmem:[%s929_s30 + $0x10] sm:$0xff]   ;;  %v793_v7 = vld [vmem:[%s936_s11 + $0x8] sm:$0xff]   ;;  %p689_p11 = scmp.ne.s32.totalorder %s829_s12, 2 }
  0x26   : > { %702 = vmatpush3.bf16.msra.mxu0 %v362_v3  ;;  %724 = vmatpush3.bf16.msra.mxu1 %v362_v3  ;;  %v794_v8 = vld [vmem:[%s936_s11] sm:$0xff]   ;;  %v797_v9 = vld [vmem:[%s929_s30 + $0x8] sm:$0xff]   ;;  %v798_v10 = vld [vmem:[%s929_s30 + $0x18] sm:$0xff]  }
  0x27   : > { %703 = vmatprep.subr.bf16.mxu0 %v791_v2  ;;  %720 = vmatprep.subr.bf16.mxu1 %v791_v2  ;;  %v292_v15 = vld [vmem:[#allocation2 + $0x30] sm:$0xff]  ;;  %v293_v27 = vld [vmem:[#allocation2] sm:$0xff] }
  0x28   : > { %711 = vmatprep.mubr.msk.bf16.mxu0 %vm347_vm1, %v795_v5  ;;  %715 = vmatprep.mubr.msk.bf16.mxu1 %vm347_vm1, %v796_v6  ;;  %v294_v11 = vld [vmem:[#allocation2 + $0x18] sm:$0xff]  ;;  %v295_v21 = vld [vmem:[#allocation2 + $0x10] sm:$0xff] }
  0x29   : > { %v296_v16 = vld [vmem:[#allocation2 + $0x8] sm:$0xff]  ;;  %v297_v28 = vld [vmem:[#allocation2 + $0x20] sm:$0xff] }
  0x2a   : > { %704 = vmatpush3.bf16.msra.mxu0 %v791_v2  ;;  %725 = vmatpush3.bf16.msra.mxu1 %v791_v2  ;;  %v298_v12 = vld [vmem:[#allocation2 + $0x28] sm:$0xff]  ;;  %v299_v22 = vld [vmem:[#allocation2 + $0x38] sm:$0xff] }
  0x2b   : > { %705 = vmatprep.subr.bf16.mxu0 %v792_v4  ;;  %721 = vmatprep.subr.bf16.mxu1 %v792_v4 }
  0x2e   : > { %706 = vmatpush3.bf16.msra.mxu0 %v792_v4  ;;  %726 = vmatpush3.bf16.msra.mxu1 %v792_v4 }
  0x2f   : > { %707 = vmatprep.subr.bf16.mxu0 %v793_v7  ;;  %722 = vmatprep.subr.bf16.mxu1 %v793_v7 }
  0x32   : > { %708 = vmatpush3.bf16.msra.mxu0 %v793_v7  ;;  %727 = vmatpush3.bf16.msra.mxu1 %v793_v7 }
  0x33   : > { %709 = vmatprep.subr.bf16.mxu0 %v794_v8  ;;  %723 = vmatprep.subr.bf16.mxu1 %v794_v8 }
  0x36   : > { %710 = vmatpush3.bf16.msra.mxu0 %v794_v8  ;;  %728 = vmatpush3.bf16.msra.mxu1 %v794_v8 }
  0x39   : > { %712 = vmatmul.mubr.msk.bf16.vlgmr.msra.gmra.mxu0 %vm347_vm1, %v797_v9  ;;  %716 = vmatmul.mubr.msk.bf16.vlgmr.msra.gmra.mxu1 %vm347_vm1, %v798_v10 }
  0xf9   : > { %v713_v13 = vpop.f32.mrf.mxu0  ;;  %v717_v14 = vpop.f32.mrf.mxu1 }
  0xfa   : > { %v431_v17 = vadd.f32 %v713_v13, %v294_v11  ;;  %v435_v18 = vadd.f32 %v717_v14, %v298_v12 }
  0xfb   : > { %v398_v19 = vpop.f32.mrf.mxu0  ;;  %v414_v20 = vpop.f32.mrf.mxu1 }
  0xfc   : > { %439 = vst [vmem:[#allocation2 + $0x18] sm:$0xff] %v431_v17  ;;  %443 = vst [vmem:[#allocation2 + $0x28] sm:$0xff] %v435_v18  ;;  %v429_v23 = vadd.f32 %v398_v19, %v292_v15  ;;  %v433_v24 = vadd.f32 %v414_v20, %v296_v16 }
  0xfd   : > { %v714_v25 = vpop.f32.mrf.mxu0  ;;  %v718_v26 = vpop.f32.mrf.mxu1 }
  0xfe   : > { %437 = vst [vmem:[#allocation2 + $0x30] sm:$0xff] %v429_v23  ;;  %441 = vst [vmem:[#allocation2 + $0x8] sm:$0xff] %v433_v24  ;;  %v432_v29 = vadd.f32 %v714_v25, %v295_v21  ;;  %v436_v30 = vadd.f32 %v718_v26, %v299_v22  ;;  %448 = sbr.rel (%p689_p11) target bundleno = 296 (0x128), region = 36 }
  0xff   : > { %v401_v31 = vpop.f32.mrf.mxu0  ;;  %v417_v32 = vpop.f32.mrf.mxu1 }
 0x100   : > { %440 = vst [vmem:[#allocation2 + $0x10] sm:$0xff] %v432_v29  ;;  %444 = vst [vmem:[#allocation2 + $0x38] sm:$0xff] %v436_v30  ;;  %v430_v33 = vadd.f32 %v401_v31, %v293_v27  ;;  %v434_v34 = vadd.f32 %v417_v32, %v297_v28 }
 0x102   : > { %438 = vst [vmem:[#allocation2] sm:$0xff] %v430_v33  ;;  %442 = vst [vmem:[#allocation2 + $0x20] sm:$0xff] %v434_v34 }
 0x103   : > { %v451_v37 = vld [vmem:[#allocation2 + $0x18] sm:$0xff]  ;;  %v455_v45 = vld [vmem:[#allocation2 + $0x28] sm:$0xff]  ;;  %vm499_vm2 = vcmask 1040384  }
 0x104   : > { %459 = vst [vmem:[%s941_s28 + $0x10] sm:$0xff] %v451_v37  ;;  %v480_v41 = vmul.f32 %v451_v37, %v451_v37  ;;  %463 = vst [vmem:[%s941_s28 + $0x30] sm:$0xff] %v455_v45  ;;  %v484_v58 = vmul.f32 %v455_v45, %v455_v45 }
 0x105   : > { %v449_v35 = vld [vmem:[#allocation2 + $0x30] sm:$0xff]  ;;  %v453_v43 = vld [vmem:[#allocation2 + $0x8] sm:$0xff] }
 0x106   : > { %457 = vst [vmem:[%s941_s28] sm:$0xff] %v449_v35  ;;  %v478_v38 = vmul.f32 %v449_v35, %v449_v35  ;;  %461 = vst [vmem:[%s941_s28 + $0x20] sm:$0xff] %v453_v43  ;;  %v482_v52 = vmul.f32 %v453_v43, %v453_v43 }
 0x107   : > { %v452_v42 = vld [vmem:[#allocation2 + $0x10] sm:$0xff]  ;;  %v456_v46 = vld [vmem:[#allocation2 + $0x38] sm:$0xff] }
 0x108   : > { %460 = vst [vmem:[%s941_s28 + $0x18] sm:$0xff] %v452_v42  ;;  %v481_v49 = vmul.f32 %v452_v42, %v452_v42  ;;  %464 = vst [vmem:[%s941_s28 + $0x38] sm:$0xff] %v456_v46  ;;  %v485_v61 = vmul.f32 %v456_v46, %v456_v46 }
 0x109   : > { %v450_v36 = vld [vmem:[#allocation2] sm:$0xff] }
 0x10a   : > { %458 = vst [vmem:[%s941_s28 + $0x8] sm:$0xff] %v450_v36  ;;  %v465_v39 = vadd.f32 %v450_v36, %v449_v35  ;;  %v479_v40 = vmul.f32 %v450_v36, %v450_v36  ;;  %v454_v44 = vld [vmem:[#allocation2 + $0x20] sm:$0xff] }
 0x10b   : > { %462 = vst [vmem:[%s941_s28 + $0x28] sm:$0xff] %v454_v44  ;;  %v483_v55 = vmul.f32 %v454_v44, %v454_v44 }
 0x10c   : > { %v486_v47 = vadd.f32 %v479_v40, %v478_v38  ;;  %v466_v48 = vadd.f32 %v465_v39, %v451_v37 }
 0x10e   : > { %v487_v50 = vadd.f32 %v486_v47, %v480_v41  ;;  %v467_v51 = vadd.f32 %v466_v48, %v452_v42 }
 0x110   : > { %v488_v53 = vadd.f32 %v487_v50, %v481_v49  ;;  %v468_v54 = vadd.f32 %v467_v51, %v453_v43 }
 0x112   : > { %v489_v56 = vadd.f32 %v488_v53, %v482_v52  ;;  %v469_v57 = vadd.f32 %v468_v54, %v454_v44 }
 0x114   : > { %v490_v59 = vadd.f32 %v489_v56, %v483_v55  ;;  %v470_v60 = vadd.f32 %v469_v57, %v455_v45 }
 0x116   : > { %v491_v62 = vadd.f32 %v490_v59, %v484_v58  ;;  %v471_v63 = vadd.f32 %v470_v60, %v456_v46 }
 0x118   : > { %v472_v0 = vrot.slane %v471_v63, 4  ;;  %v492_v1 = vadd.f32 %v491_v62, %v485_v61 }
 0x11a   : > { %v473_v2 = vadd.f32 %v472_v0, %v471_v63  ;;  %v493_v3 = vrot.slane %v492_v1, 4 }
 0x11c   : > { %v474_v4 = vrot.slane %v473_v2, 2  ;;  %v494_v5 = vadd.f32 %v493_v3, %v492_v1 }
 0x11e   : > { %v475_v6 = vadd.f32 %v474_v4, %v473_v2  ;;  %v495_v7 = vrot.slane %v494_v5, 2 }
 0x120   : > { %v476_v8 = vrot.slane %v475_v6, 1  ;;  %v496_v9 = vadd.f32 %v495_v7, %v494_v5 }
 0x122   : > { %v477_v10 = vadd.f32 %v476_v8, %v475_v6  ;;  %v497_v11 = vrot.slane %v496_v9, 1 }
 0x124   : > { %v498_v12 = vadd.f32 %v497_v11, %v496_v9 }
 0x126   : > { %v500_v13 = vsel %vm499_vm2, %v477_v10, %v498_v12 }
 0x127   : > { %501 = vst [vmem:[%s946_s29] sm:$0x3] %v500_v13 }
 0x128 PF: > { %s14_s18 = sadd.s32 1, %s853_s18   ;;  %s998_s21 = sld [smem:[#allocation3_spill]] }
 0x129   : > { %p11_p12 = scmp.ge.s32.totalorder %s14_s18, 50   ;;  %s999_s12 = smov %s841_s15 }
 0x12a   : > { %s1000_s13 = smov %s845_s16  ;;  %s1001_s14 = smov %s849_s17 }
 0x12b   : > { %s1002_s15 = smov %s1006_s19  ;;  %s1003_s16 = smov %s1010_s20 }
 0x12c   :  { %13 = sbr.rel (!%p11_p12) target bundleno = 4 (0x4), region = 81 }
 0x12e   : > { %s1004_s17 = smov %s998_s21 }

// kernel: basic_block_forward.5
= control target key start
LH: loop header
LB: loop body
LE: loop exit
PB: predicated region body
PF: predicated region fallthrough
CT: control target
= control target key end

     0   :  { %s1188_s12 = smov 0   ;;  %s1447_s0 = inlined_call_operand.vmem [shape: f32[1024,128], index: 0, kind: input, shape index: {}]   ;;  %s1448_s1 = inlined_call_operand.vmem [shape: f32[1,128], index: 1, kind: input, shape index: {}]   ;;  %s1449_s2 = inlined_call_operand.vmem [shape: f32[1,128], index: 2, kind: input, shape index: {}]   ;;  %s1450_s3 = inlined_call_operand.vmem [shape: bf16[1024,128], index: 3, kind: output, shape index: {}]  }
   0x1 LB: > { %s820_s13 = sadd.s32 4294967295, %s1166_s12   ;;  %p824_p0 = scmp.ge.s32.totalorder %s1166_s12, 1  ;;  %s1166_s12 = sphi %s1188_s12, %s13_s12  }
   0x2   : > { %p138_p1 = scmp.lt.s32.totalorder %s1166_s12, 3 }
   0x4   : > { %p139_p2 = pnand %p824_p0, %p138_p1 }
   0x5   : > { %s825_s14 = sshll.u32 (!%p139_p2), %s820_s13, 6 }
   0x6   : > { %142 = sbr.rel (%p139_p2) target bundleno = 77 (0x4d), region = 32  ;;  %p163_p3 = scmp.lt.s32.totalorder (!%p139_p2), %s825_s14, 127 }
   0xb   : > { %s1452_s14 = smov (!%p163_p3, %s825_s14), 127  ;;  %v1202_v0 = vld [vmem:[%s1448_s1] ss:$0 sm:$0xff] }
   0xc   : > { %s826_s15 = sshll.u32 %s1452_s14, 3  ;;  %v1212_v1 = vld [vmem:[%s1449_s2] ss:$0 sm:$0xff]  ;;  %s828_s23 = sshll.u32 %s1452_s14, 2 }
   0xd   : > { %s1207_s20 = scalar_lea.vmem %s1447_s0, %s826_s15  ;;  %s1244_s26 = scalar_lea.vmem %s1450_s3, %s828_s23 }
   0xe   : > { %v174_v2 = vld [vmem:[%s1207_s20] sm:$0xff]  ;;  %v175_v3 = vld [vmem:[%s1207_s20 + $0x8] sm:$0xff]  ;;  %v176_v4 = vld [vmem:[%s1207_s20 + $0x10] sm:$0xff] }
   0xf   : > { %v245_v5 = vmul.f32 %v1202_v0, %v174_v2  ;;  %v246_v6 = vmul.f32 %v1202_v0, %v175_v3  ;;  %v177_v7 = vld [vmem:[%s1207_s20 + $0x18] sm:$0xff]  ;;  %v247_v8 = vmul.f32 %v1202_v0, %v176_v4  ;;  %v178_v9 = vld [vmem:[%s1207_s20 + $0x20] sm:$0xff]  ;;  %v179_v10 = vld [vmem:[%s1207_s20 + $0x28] sm:$0xff] }
  0x10   : > { %v248_v11 = vmul.f32 %v1202_v0, %v177_v7  ;;  %v249_v12 = vmul.f32 %v1202_v0, %v178_v9  ;;  %v250_v13 = vmul.f32 %v1202_v0, %v179_v10  ;;  %v180_v14 = vld [vmem:[%s1207_s20 + $0x30] sm:$0xff]  ;;  %v181_v15 = vld [vmem:[%s1207_s20 + $0x38] sm:$0xff]  ;;  %v182_v24 = vld [vmem:[%s1207_s20 + $0x40] sm:$0xff] }
  0x11   : > { %v316_v16 = vadd.f32 %v1212_v1, %v245_v5  ;;  %v317_v17 = vadd.f32 %v1212_v1, %v246_v6  ;;  %v318_v18 = vadd.f32 %v1212_v1, %v247_v8  ;;  %v251_v19 = vmul.f32 %v1202_v0, %v180_v14  ;;  %v183_v25 = vld [vmem:[%s1207_s20 + $0x48] sm:$0xff]  ;;  %v184_v30 = vld [vmem:[%s1207_s20 + $0x50] sm:$0xff]  ;;  %v185_v35 = vld [vmem:[%s1207_s20 + $0x58] sm:$0xff] }
  0x12   : > { %v319_v20 = vadd.f32 %v1212_v1, %v248_v11  ;;  %v320_v21 = vadd.f32 %v1212_v1, %v249_v12  ;;  %v321_v22 = vadd.f32 %v1212_v1, %v250_v13  ;;  %v252_v23 = vmul.f32 %v1202_v0, %v181_v15  ;;  %v186_v36 = vld [vmem:[%s1207_s20 + $0x60] sm:$0xff]  ;;  %v187_v41 = vld [vmem:[%s1207_s20 + $0x68] sm:$0xff]  ;;  %v188_v42 = vld [vmem:[%s1207_s20 + $0x70] sm:$0xff] }
  0x13   : > { %v380_v26 = vmax.f32 %v316_v16, 0.0  ;;  %v381_v27 = vmax.f32 %v317_v17, 0.0  ;;  %v382_v28 = vmax.f32 %v318_v18, 0.0  ;;  %v322_v29 = vadd.f32 %v1212_v1, %v251_v19  ;;  %v189_v51 = vld [vmem:[%s1207_s20 + $0x78] sm:$0xff]  ;;  %v190_v56 = vld [vmem:[%s1207_s20 + $0x80] sm:$0xff]  ;;  %v191_v61 = vld [vmem:[%s1207_s20 + $0x88] sm:$0xff] }
  0x14   : > { %v383_v31 = vmax.f32 %v319_v20, 0.0  ;;  %v384_v32 = vmax.f32 %v320_v21, 0.0  ;;  %v385_v33 = vmax.f32 %v321_v22, 0.0  ;;  %v323_v34 = vadd.f32 %v1212_v1, %v252_v23  ;;  %v192_v4 = vld [vmem:[%s1207_s20 + $0x90] sm:$0xff]  ;;  %v193_v5 = vld [vmem:[%s1207_s20 + $0x98] sm:$0xff]  ;;  %v194_v10 = vld [vmem:[%s1207_s20 + $0xa0] sm:$0xff] }
  0x15   : > { %v964_v37 = vpack.c.bf16 %v381_v27, %v380_v26  ;;  %v386_v38 = vmax.f32 %v322_v29, 0.0  ;;  %v253_v39 = vmul.f32 %v1202_v0, %v182_v24  ;;  %v254_v40 = vmul.f32 %v1202_v0, %v183_v25  ;;  %v195_v15 = vld [vmem:[%s1207_s20 + $0xa8] sm:$0xff]  ;;  %v196_v20 = vld [vmem:[%s1207_s20 + $0xb0] sm:$0xff]  ;;  %v197_v25 = vld [vmem:[%s1207_s20 + $0xb8] sm:$0xff] }
  0x16   : > { %v969_v43 = vpack.c.bf16 %v383_v31, %v382_v28  ;;  %v974_v44 = vpack.c.bf16 %v385_v33, %v384_v32  ;;  %v387_v45 = vmax.f32 %v323_v34, 0.0  ;;  %v255_v46 = vmul.f32 %v1202_v0, %v184_v30  ;;  %v198_v30 = vld [vmem:[%s1207_s20 + $0xc0] sm:$0xff] }
  0x17   : > { %965 = vst [vmem:[%s1244_s26] sm:$0xff] %v964_v37   ;;  %v324_v47 = vadd.f32 %v1212_v1, %v253_v39  ;;  %v325_v48 = vadd.f32 %v1212_v1, %v254_v40  ;;  %v256_v49 = vmul.f32 %v1202_v0, %v185_v35  ;;  %v257_v50 = vmul.f32 %v1202_v0, %v186_v36  ;;  %v199_v35 = vld [vmem:[%s1207_s20 + $0xc8] sm:$0xff]  ;;  %v200_v40 = vld [vmem:[%s1207_s20 + $0xd0] sm:$0xff] }
  0x18   : > { %1121 = vst [vmem:[%s1244_s26 + $0x8] sm:$0xff] %v969_v43   ;;  %1122 = vst [vmem:[%s1244_s26 + $0x10] sm:$0xff] %v974_v44   ;;  %v979_v52 = vpack.c.bf16 %v387_v45, %v386_v38  ;;  %v326_v53 = vadd.f32 %v1212_v1, %v255_v46  ;;  %v258_v54 = vmul.f32 %v1202_v0, %v187_v41  ;;  %v201_v41 = vld [vmem:[%s1207_s20 + $0xd8] sm:$0xff]  ;;  %v202_v46 = vld [vmem:[%s1207_s20 + $0xe0] sm:$0xff] }
  0x19   : > { %v259_v55 = vmul.f32 %v1202_v0, %v188_v42  ;;  %v388_v57 = vmax.f32 %v324_v47, 0.0  ;;  %v389_v58 = vmax.f32 %v325_v48, 0.0  ;;  %v327_v59 = vadd.f32 %v1212_v1, %v256_v49 }
  0x1a   : > { %v328_v60 = vadd.f32 %v1212_v1, %v257_v50  ;;  %1123 = vst [vmem:[%s1244_s26 + $0x18] sm:$0xff] %v979_v52   ;;  %v390_v62 = vmax.f32 %v326_v53, 0.0  ;;  %v329_v63 = vadd.f32 %v1212_v1, %v258_v54  ;;  %v260_v2 = vmul.f32 %v1202_v0, %v189_v51  ;;  %v203_v51 = vld [vmem:[%s1207_s20 + $0xe8] sm:$0xff] }
  0x1b   : > { %v330_v3 = vadd.f32 %v1212_v1, %v259_v55  ;;  %v984_v6 = vpack.c.bf16 %v389_v58, %v388_v57  ;;  %v391_v7 = vmax.f32 %v327_v59, 0.0  ;;  %v261_v9 = vmul.f32 %v1202_v0, %v190_v56  ;;  %v204_v56 = vld [vmem:[%s1207_s20 + $0xf0] sm:$0xff] }
  0x1c   : > { %v392_v8 = vmax.f32 %v328_v60, 0.0  ;;  %v393_v11 = vmax.f32 %v329_v63, 0.0  ;;  %v331_v12 = vadd.f32 %v1212_v1, %v260_v2  ;;  %v262_v14 = vmul.f32 %v1202_v0, %v191_v61  ;;  %v205_v61 = vld [vmem:[%s1207_s20 + $0xf8] sm:$0xff] }
  0x1d   : > { %v394_v13 = vmax.f32 %v330_v3, 0.0  ;;  %1124 = vst [vmem:[%s1244_s26 + $0x20] sm:$0xff] %v984_v6   ;;  %v989_v16 = vpack.c.bf16 %v391_v7, %v390_v62  ;;  %v332_v17 = vadd.f32 %v1212_v1, %v261_v9  ;;  %v263_v18 = vmul.f32 %v1202_v0, %v192_v4  ;;  %v206_v4 = vld [vmem:[%s1207_s20 + $0x100] sm:$0xff]  ;;  %v207_v9 = vld [vmem:[%s1207_s20 + $0x108] sm:$0xff] }
  0x1e   : > { %v264_v19 = vmul.f32 %v1202_v0, %v193_v5  ;;  %v994_v21 = vpack.c.bf16 %v393_v11, %v392_v8  ;;  %v395_v22 = vmax.f32 %v331_v12, 0.0  ;;  %v333_v23 = vadd.f32 %v1212_v1, %v262_v14  ;;  %v208_v14 = vld [vmem:[%s1207_s20 + $0x110] sm:$0xff] }
  0x1f   : > { %v265_v24 = vmul.f32 %v1202_v0, %v194_v10  ;;  %1125 = vst [vmem:[%s1244_s26 + $0x28] sm:$0xff] %v989_v16   ;;  %v396_v26 = vmax.f32 %v332_v17, 0.0  ;;  %v334_v27 = vadd.f32 %v1212_v1, %v263_v18  ;;  %v266_v29 = vmul.f32 %v1202_v0, %v195_v15  ;;  %v209_v15 = vld [vmem:[%s1207_s20 + $0x118] sm:$0xff] }
  0x20   : > { %v335_v28 = vadd.f32 %v1212_v1, %v264_v19  ;;  %1126 = vst [vmem:[%s1244_s26 + $0x30] sm:$0xff] %v994_v21   ;;  %v999_v31 = vpack.c.bf16 %v395_v22, %v394_v13  ;;  %v397_v32 = vmax.f32 %v333_v23, 0.0  ;;  %v267_v34 = vmul.f32 %v1202_v0, %v196_v20  ;;  %v210_v20 = vld [vmem:[%s1207_s20 + $0x120] sm:$0xff] }
  0x21   : > { %v336_v33 = vadd.f32 %v1212_v1, %v265_v24  ;;  %v398_v36 = vmax.f32 %v334_v27, 0.0  ;;  %v337_v38 = vadd.f32 %v1212_v1, %v266_v29  ;;  %v268_v39 = vmul.f32 %v1202_v0, %v197_v25  ;;  %v211_v25 = vld [vmem:[%s1207_s20 + $0x128] sm:$0xff] }
  0x22   : > { %v399_v37 = vmax.f32 %v335_v28, 0.0  ;;  %1127 = vst [vmem:[%s1244_s26 + $0x38] sm:$0xff] %v999_v31   ;;  %v1004_v42 = vpack.c.bf16 %v397_v32, %v396_v26  ;;  %v338_v44 = vadd.f32 %v1212_v1, %v267_v34  ;;  %v269_v45 = vmul.f32 %v1202_v0, %v198_v30  ;;  %v212_v30 = vld [vmem:[%s1207_s20 + $0x130] sm:$0xff] }
  0x23   : > { %v400_v43 = vmax.f32 %v336_v33, 0.0  ;;  %v401_v48 = vmax.f32 %v337_v38, 0.0  ;;  %v339_v49 = vadd.f32 %v1212_v1, %v268_v39  ;;  %v270_v50 = vmul.f32 %v1202_v0, %v199_v35  ;;  %v213_v35 = vld [vmem:[%s1207_s20 + $0x138] sm:$0xff] }
  0x24   : > { %v1009_v47 = vpack.c.bf16 %v399_v37, %v398_v36  ;;  %1128 = vst [vmem:[%s1244_s26 + $0x40] sm:$0xff] %v1004_v42   ;;  %v402_v52 = vmax.f32 %v338_v44, 0.0  ;;  %v340_v53 = vadd.f32 %v1212_v1, %v269_v45  ;;  %v271_v54 = vmul.f32 %v1202_v0, %v200_v40  ;;  %v214_v40 = vld [vmem:[%s1207_s20 + $0x140] sm:$0xff]  ;;  %v215_v45 = vld [vmem:[%s1207_s20 + $0x148] sm:$0xff] }
  0x25   : > { %v272_v55 = vmul.f32 %v1202_v0, %v201_v41  ;;  %v1014_v57 = vpack.c.bf16 %v401_v48, %v400_v43  ;;  %v403_v58 = vmax.f32 %v339_v49, 0.0  ;;  %v341_v59 = vadd.f32 %v1212_v1, %v270_v50  ;;  %v216_v50 = vld [vmem:[%s1207_s20 + $0x150] sm:$0xff] }
  0x26   : > { %1129 = vst [vmem:[%s1244_s26 + $0x48] sm:$0xff] %v1009_v47   ;;  %v273_v60 = vmul.f32 %v1202_v0, %v202_v46  ;;  %v404_v62 = vmax.f32 %v340_v53, 0.0  ;;  %v342_v63 = vadd.f32 %v1212_v1, %v271_v54  ;;  %v274_v3 = vmul.f32 %v1202_v0, %v203_v51  ;;  %v217_v51 = vld [vmem:[%s1207_s20 + $0x158] sm:$0xff] }
  0x27   : > { %v343_v2 = vadd.f32 %v1212_v1, %v272_v55  ;;  %1130 = vst [vmem:[%s1244_s26 + $0x50] sm:$0xff] %v1014_v57   ;;  %v1019_v5 = vpack.c.bf16 %v403_v58, %v402_v52  ;;  %v405_v6 = vmax.f32 %v341_v59, 0.0  ;;  %v275_v8 = vmul.f32 %v1202_v0, %v204_v56  ;;  %v218_v56 = vld [vmem:[%s1207_s20 + $0x160] sm:$0xff] }
  0x28   : > { %v344_v7 = vadd.f32 %v1212_v1, %v273_v60  ;;  %v406_v10 = vmax.f32 %v342_v63, 0.0  ;;  %v345_v12 = vadd.f32 %v1212_v1, %v274_v3  ;;  %v276_v13 = vmul.f32 %v1202_v0, %v205_v61  ;;  %v219_v61 = vld [vmem:[%s1207_s20 + $0x168] sm:$0xff] }
  0x29   : > { %v407_v11 = vmax.f32 %v343_v2, 0.0  ;;  %1131 = vst [vmem:[%s1244_s26 + $0x58] sm:$0xff] %v1019_v5   ;;  %v1024_v16 = vpack.c.bf16 %v405_v6, %v404_v62  ;;  %v346_v18 = vadd.f32 %v1212_v1, %v275_v8  ;;  %v277_v19 = vmul.f32 %v1202_v0, %v206_v4  ;;  %v220_v4 = vld [vmem:[%s1207_s20 + $0x170] sm:$0xff] }
  0x2a   : > { %v408_v17 = vmax.f32 %v344_v7, 0.0  ;;  %v409_v22 = vmax.f32 %v345_v12, 0.0  ;;  %v347_v23 = vadd.f32 %v1212_v1, %v276_v13  ;;  %v278_v24 = vmul.f32 %v1202_v0, %v207_v9  ;;  %v221_v9 = vld [vmem:[%s1207_s20 + $0x178] sm:$0xff] }
  0x2b   : > { %v1029_v21 = vpack.c.bf16 %v407_v11, %v406_v10  ;;  %1132 = vst [vmem:[%s1244_s26 + $0x60] sm:$0xff] %v1024_v16   ;;  %v410_v26 = vmax.f32 %v346_v18, 0.0  ;;  %v348_v27 = vadd.f32 %v1212_v1, %v277_v19  ;;  %v279_v28 = vmul.f32 %v1202_v0, %v208_v14  ;;  %v222_v14 = vld [vmem:[%s1207_s20 + $0x180] sm:$0xff]  ;;  %v223_v19 = vld [vmem:[%s1207_s20 + $0x188] sm:$0xff] }
  0x2c   : > { %v280_v29 = vmul.f32 %v1202_v0, %v209_v15  ;;  %v1034_v31 = vpack.c.bf16 %v409_v22, %v408_v17  ;;  %v411_v32 = vmax.f32 %v347_v23, 0.0  ;;  %v349_v33 = vadd.f32 %v1212_v1, %v278_v24  ;;  %v224_v24 = vld [vmem:[%s1207_s20 + $0x190] sm:$0xff] }
  0x2d   : > { %1133 = vst [vmem:[%s1244_s26 + $0x68] sm:$0xff] %v1029_v21   ;;  %v281_v34 = vmul.f32 %v1202_v0, %v210_v20  ;;  %v412_v36 = vmax.f32 %v348_v27, 0.0  ;;  %v350_v37 = vadd.f32 %v1212_v1, %v279_v28  ;;  %v282_v39 = vmul.f32 %v1202_v0, %v211_v25  ;;  %v225_v25 = vld [vmem:[%s1207_s20 + $0x198] sm:$0xff] }
  0x2e   : > { %v351_v38 = vadd.f32 %v1212_v1, %v280_v29  ;;  %1134 = vst [vmem:[%s1244_s26 + $0x70] sm:$0xff] %v1034_v31   ;;  %v1039_v41 = vpack.c.bf16 %v411_v32, %v410_v26  ;;  %v413_v42 = vmax.f32 %v349_v33, 0.0  ;;  %v283_v44 = vmul.f32 %v1202_v0, %v212_v30  ;;  %v226_v30 = vld [vmem:[%s1207_s20 + $0x1a0] sm:$0xff] }
  0x2f   : > { %v352_v43 = vadd.f32 %v1212_v1, %v281_v34  ;;  %v414_v46 = vmax.f32 %v350_v37, 0.0  ;;  %v353_v48 = vadd.f32 %v1212_v1, %v282_v39  ;;  %v284_v49 = vmul.f32 %v1202_v0, %v213_v35  ;;  %v227_v35 = vld [vmem:[%s1207_s20 + $0x1a8] sm:$0xff] }
  0x30   : > { %v415_v47 = vmax.f32 %v351_v38, 0.0  ;;  %1135 = vst [vmem:[%s1244_s26 + $0x78] sm:$0xff] %v1039_v41   ;;  %v1044_v52 = vpack.c.bf16 %v413_v42, %v412_v36  ;;  %v354_v54 = vadd.f32 %v1212_v1, %v283_v44  ;;  %v285_v55 = vmul.f32 %v1202_v0, %v214_v40  ;;  %v228_v40 = vld [vmem:[%s1207_s20 + $0x1b0] sm:$0xff] }
  0x31   : > { %v416_v53 = vmax.f32 %v352_v43, 0.0  ;;  %v417_v58 = vmax.f32 %v353_v48, 0.0  ;;  %v355_v59 = vadd.f32 %v1212_v1, %v284_v49  ;;  %v286_v60 = vmul.f32 %v1202_v0, %v215_v45  ;;  %v229_v45 = vld [vmem:[%s1207_s20 + $0x1b8] sm:$0xff] }
  0x32   : > { %v1049_v57 = vpack.c.bf16 %v415_v47, %v414_v46  ;;  %1136 = vst [vmem:[%s1244_s26 + $0x80] sm:$0xff] %v1044_v52   ;;  %v418_v62 = vmax.f32 %v354_v54, 0.0  ;;  %v356_v63 = vadd.f32 %v1212_v1, %v285_v55  ;;  %v287_v2 = vmul.f32 %v1202_v0, %v216_v50  ;;  %v230_v50 = vld [vmem:[%s1207_s20 + $0x1c0] sm:$0xff]  ;;  %v231_v55 = vld [vmem:[%s1207_s20 + $0x1c8] sm:$0xff] }
  0x33   : > { %v288_v3 = vmul.f32 %v1202_v0, %v217_v51  ;;  %v1054_v5 = vpack.c.bf16 %v417_v58, %v416_v53  ;;  %v419_v6 = vmax.f32 %v355_v59, 0.0  ;;  %v357_v7 = vadd.f32 %v1212_v1, %v286_v60  ;;  %v232_v60 = vld [vmem:[%s1207_s20 + $0x1d0] sm:$0xff] }
  0x34   : > { %1137 = vst [vmem:[%s1244_s26 + $0x88] sm:$0xff] %v1049_v57   ;;  %v289_v8 = vmul.f32 %v1202_v0, %v218_v56  ;;  %v420_v10 = vmax.f32 %v356_v63, 0.0  ;;  %v358_v11 = vadd.f32 %v1212_v1, %v287_v2  ;;  %v290_v13 = vmul.f32 %v1202_v0, %v219_v61  ;;  %v233_v61 = vld [vmem:[%s1207_s20 + $0x1d8] sm:$0xff] }
  0x35   : > { %v359_v12 = vadd.f32 %v1212_v1, %v288_v3  ;;  %1138 = vst [vmem:[%s1244_s26 + $0x90] sm:$0xff] %v1054_v5   ;;  %v1059_v15 = vpack.c.bf16 %v419_v6, %v418_v62  ;;  %v421_v16 = vmax.f32 %v357_v7, 0.0  ;;  %v291_v18 = vmul.f32 %v1202_v0, %v220_v4  ;;  %v234_v4 = vld [vmem:[%s1207_s20 + $0x1e0] sm:$0xff] }
  0x36   : > { %v360_v17 = vadd.f32 %v1212_v1, %v289_v8  ;;  %v422_v20 = vmax.f32 %v358_v11, 0.0  ;;  %v361_v22 = vadd.f32 %v1212_v1, %v290_v13  ;;  %v292_v23 = vmul.f32 %v1202_v0, %v221_v9  ;;  %v235_v9 = vld [vmem:[%s1207_s20 + $0x1e8] sm:$0xff] }
  0x37   : > { %v423_v21 = vmax.f32 %v359_v12, 0.0  ;;  %1139 = vst [vmem:[%s1244_s26 + $0x98] sm:$0xff] %v1059_v15   ;;  %v1064_v26 = vpack.c.bf16 %v421_v16, %v420_v10  ;;  %v362_v28 = vadd.f32 %v1212_v1, %v291_v18  ;;  %v293_v29 = vmul.f32 %v1202_v0, %v222_v14  ;;  %v236_v14 = vld [vmem:[%s1207_s20 + $0x1f0] sm:$0xff] }
  0x38   : > { %v424_v27 = vmax.f32 %v360_v17, 0.0  ;;  %v425_v32 = vmax.f32 %v361_v22, 0.0  ;;  %v363_v33 = vadd.f32 %v1212_v1, %v292_v23  ;;  %v294_v34 = vmul.f32 %v1202_v0, %v223_v19  ;;  %v237_v19 = vld [vmem:[%s1207_s20 + $0x1f8] sm:$0xff] }
  0x39   : > { %v1069_v31 = vpack.c.bf16 %v423_v21, %v422_v20  ;;  %1140 = vst [vmem:[%s1244_s26 + $0xa0] sm:$0xff] %v1064_v26   ;;  %v426_v36 = vmax.f32 %v362_v28, 0.0  ;;  %v364_v37 = vadd.f32 %v1212_v1, %v293_v29  ;;  %v295_v38 = vmul.f32 %v1202_v0, %v224_v24 }
  0x3a   : > { %v296_v39 = vmul.f32 %v1202_v0, %v225_v25  ;;  %v1074_v41 = vpack.c.bf16 %v425_v32, %v424_v27  ;;  %v427_v42 = vmax.f32 %v363_v33, 0.0  ;;  %v365_v43 = vadd.f32 %v1212_v1, %v294_v34 }
  0x3b   : > { %1141 = vst [vmem:[%s1244_s26 + $0xa8] sm:$0xff] %v1069_v31   ;;  %v297_v44 = vmul.f32 %v1202_v0, %v226_v30  ;;  %v428_v46 = vmax.f32 %v364_v37, 0.0  ;;  %v366_v47 = vadd.f32 %v1212_v1, %v295_v38  ;;  %v298_v49 = vmul.f32 %v1202_v0, %v227_v35 }
  0x3c   : > { %v367_v48 = vadd.f32 %v1212_v1, %v296_v39  ;;  %1142 = vst [vmem:[%s1244_s26 + $0xb0] sm:$0xff] %v1074_v41   ;;  %v1079_v51 = vpack.c.bf16 %v427_v42, %v426_v36  ;;  %v429_v52 = vmax.f32 %v365_v43, 0.0  ;;  %v299_v54 = vmul.f32 %v1202_v0, %v228_v40 }
  0x3d   : > { %v368_v53 = vadd.f32 %v1212_v1, %v297_v44  ;;  %v430_v56 = vmax.f32 %v366_v47, 0.0  ;;  %v369_v58 = vadd.f32 %v1212_v1, %v298_v49  ;;  %v300_v59 = vmul.f32 %v1202_v0, %v229_v45 }
  0x3e   : > { %v431_v57 = vmax.f32 %v367_v48, 0.0  ;;  %1143 = vst [vmem:[%s1244_s26 + $0xb8] sm:$0xff] %v1079_v51   ;;  %v1084_v62 = vpack.c.bf16 %v429_v52, %v428_v46  ;;  %v370_v2 = vadd.f32 %v1212_v1, %v299_v54  ;;  %v301_v3 = vmul.f32 %v1202_v0, %v230_v50 }
  0x3f   : > { %v432_v63 = vmax.f32 %v368_v53, 0.0  ;;  %v433_v6 = vmax.f32 %v369_v58, 0.0  ;;  %v371_v7 = vadd.f32 %v1212_v1, %v300_v59  ;;  %v302_v8 = vmul.f32 %v1202_v0, %v231_v55 }
  0x40   : > { %v1089_v5 = vpack.c.bf16 %v431_v57, %v430_v56  ;;  %1144 = vst [vmem:[%s1244_s26 + $0xc0] sm:$0xff] %v1084_v62   ;;  %v434_v10 = vmax.f32 %v370_v2, 0.0  ;;  %v372_v11 = vadd.f32 %v1212_v1, %v301_v3  ;;  %v303_v12 = vmul.f32 %v1202_v0, %v232_v60 }
  0x41   : > { %v304_v13 = vmul.f32 %v1202_v0, %v233_v61  ;;  %v1094_v15 = vpack.c.bf16 %v433_v6, %v432_v63  ;;  %v435_v16 = vmax.f32 %v371_v7, 0.0  ;;  %v373_v17 = vadd.f32 %v1212_v1, %v302_v8 }
  0x42   : > { %1145 = vst [vmem:[%s1244_s26 + $0xc8] sm:$0xff] %v1089_v5   ;;  %v305_v18 = vmul.f32 %v1202_v0, %v234_v4  ;;  %v436_v20 = vmax.f32 %v372_v11, 0.0  ;;  %v374_v21 = vadd.f32 %v1212_v1, %v303_v12  ;;  %v306_v23 = vmul.f32 %v1202_v0, %v235_v9 }
  0x43   : > { %v375_v22 = vadd.f32 %v1212_v1, %v304_v13  ;;  %1146 = vst [vmem:[%s1244_s26 + $0xd0] sm:$0xff] %v1094_v15   ;;  %v1099_v24 = vpack.c.bf16 %v435_v16, %v434_v10  ;;  %v437_v25 = vmax.f32 %v373_v17, 0.0  ;;  %v307_v27 = vmul.f32 %v1202_v0, %v236_v14 }
  0x44   : > { %v376_v26 = vadd.f32 %v1212_v1, %v305_v18  ;;  %v438_v28 = vmax.f32 %v374_v21, 0.0  ;;  %v377_v30 = vadd.f32 %v1212_v1, %v306_v23  ;;  %v308_v31 = vmul.f32 %v1202_v0, %v237_v19 }
  0x45   : > { %v439_v29 = vmax.f32 %v375_v22, 0.0  ;;  %1147 = vst [vmem:[%s1244_s26 + $0xd8] sm:$0xff] %v1099_v24   ;;  %v1104_v32 = vpack.c.bf16 %v437_v25, %v436_v20  ;;  %v378_v34 = vadd.f32 %v1212_v1, %v307_v27 }
  0x46   : > { %v440_v33 = vmax.f32 %v376_v26, 0.0  ;;  %v441_v36 = vmax.f32 %v377_v30, 0.0  ;;  %v379_v37 = vadd.f32 %v1212_v1, %v308_v31 }
  0x47   : > { %v1109_v35 = vpack.c.bf16 %v439_v29, %v438_v28  ;;  %1148 = vst [vmem:[%s1244_s26 + $0xe0] sm:$0xff] %v1104_v32   ;;  %v442_v38 = vmax.f32 %v378_v34, 0.0 }
  0x48   : > { %v1114_v39 = vpack.c.bf16 %v441_v36, %v440_v33  ;;  %v443_v40 = vmax.f32 %v379_v37, 0.0 }
  0x49   : > { %1149 = vst [vmem:[%s1244_s26 + $0xe8] sm:$0xff] %v1109_v35  }
  0x4a   : > { %1150 = vst [vmem:[%s1244_s26 + $0xf0] sm:$0xff] %v1114_v39   ;;  %v1119_v41 = vpack.c.bf16 %v443_v40, %v442_v38 }
  0x4c   : > { %1151 = vst [vmem:[%s1244_s26 + $0xf8] sm:$0xff] %v1119_v41  }
  0x4d PF: > { %s13_s12 = sadd.s32 1, %s1166_s12  }
  0x4e   : > { %p10_p4 = scmp.ge.s32.totalorder %s13_s12, 4  }
  0x50   :  { %12 = sbr.rel (!%p10_p4) target bundleno = 1 (0x1), region = 62 }

// kernel: basic_block_forward.7
= control target key start
LH: loop header
LB: loop body
LE: loop exit
PB: predicated region body
PF: predicated region fallthrough
CT: control target
= control target key end

     0   :  { %s809_s15 = smov 0   ;;  %s1170_s0 = inlined_call_operand.vmem [shape: f32[1024,128], index: 0, kind: input, shape index: {}]   ;;  %s1171_s1 = inlined_call_operand.vmem [shape: f32[1024,128], index: 1, kind: input, shape index: {}]   ;;  %s1172_s2 = inlined_call_operand.vmem [shape: f32[1,128], index: 2, kind: input, shape index: {}]   ;;  %s1173_s3 = inlined_call_operand.vmem [shape: f32[1,128], index: 3, kind: input, shape index: {}]   ;;  %s1174_s4 = inlined_call_operand.vmem [shape: f32[1024,128], index: 4, kind: output, shape index: {}]  }
   0x1 LB: > { %s753_s16 = sadd.s32 4294967295, %s782_s15   ;;  %p757_p0 = scmp.ge.s32.totalorder %s782_s15, 1  ;;  %s782_s15 = sphi %s809_s15, %s14_s15  }
   0x2   : > { %p174_p1 = scmp.lt.s32.totalorder %s782_s15, 3 }
   0x4   : > { %p175_p2 = pnand %p757_p0, %p174_p1 }
   0x5   : > { %s758_s17 = sshll.u32 (!%p175_p2), %s753_s16, 6 }
   0x6   : > { %178 = sbr.rel (%p175_p2) target bundleno = 85 (0x55), region = 36  ;;  %p206_p3 = scmp.lt.s32.totalorder (!%p175_p2), %s758_s17, 127 }
   0xb   : > { %s1176_s17 = smov (!%p206_p3, %s758_s17), 127  ;;  %v822_v0 = vld [vmem:[%s1172_s2] ss:$0 sm:$0xff] }
   0xc   : > { %s817_s18 = sshll.u32 %s1176_s17, 3  ;;  %v840_v2 = vld [vmem:[%s1173_s3] ss:$0 sm:$0xff] }
   0xd   : > { %s828_s23 = scalar_lea.vmem %s1170_s0, %s817_s18  ;;  %s834_s26 = scalar_lea.vmem %s1171_s1, %s817_s18 }
   0xe   : > { %v223_v1 = vld [vmem:[%s828_s23] sm:$0xff]  ;;  %v224_v3 = vld [vmem:[%s828_s23 + $0x8] sm:$0xff]  ;;  %v225_v7 = vld [vmem:[%s828_s23 + $0x10] sm:$0xff]  ;;  %s870_s5 = scalar_lea.vmem %s1174_s4, %s817_s18 }
   0xf   : > { %v294_v4 = vmul.f32 %v822_v0, %v223_v1  ;;  %v429_v5 = vld [vmem:[%s834_s26] sm:$0xff]  ;;  %v295_v6 = vmul.f32 %v822_v0, %v224_v3  ;;  %v430_v8 = vld [vmem:[%s834_s26 + $0x8] sm:$0xff]  ;;  %v296_v9 = vmul.f32 %v822_v0, %v225_v7  ;;  %v226_v10 = vld [vmem:[%s828_s23 + $0x18] sm:$0xff] }
  0x10   : > { %v227_v11 = vld [vmem:[%s828_s23 + $0x20] sm:$0xff]  ;;  %v431_v14 = vld [vmem:[%s834_s26 + $0x10] sm:$0xff]  ;;  %v297_v15 = vmul.f32 %v822_v0, %v226_v10  ;;  %v432_v16 = vld [vmem:[%s834_s26 + $0x18] sm:$0xff] }
  0x11   : > { %v365_v12 = vadd.f32 %v840_v2, %v294_v4  ;;  %v366_v13 = vadd.f32 %v840_v2, %v295_v6  ;;  %v298_v17 = vmul.f32 %v822_v0, %v227_v11  ;;  %v228_v18 = vld [vmem:[%s828_s23 + $0x28] sm:$0xff]  ;;  %v367_v19 = vadd.f32 %v840_v2, %v296_v9  ;;  %v433_v20 = vld [vmem:[%s834_s26 + $0x20] sm:$0xff]  ;;  %v229_v22 = vld [vmem:[%s828_s23 + $0x30] sm:$0xff] }
  0x12   : > { %v299_v21 = vmul.f32 %v822_v0, %v228_v18  ;;  %v230_v23 = vld [vmem:[%s828_s23 + $0x38] sm:$0xff]  ;;  %v368_v26 = vadd.f32 %v840_v2, %v297_v15  ;;  %v434_v28 = vld [vmem:[%s834_s26 + $0x28] sm:$0xff]  ;;  %v300_v31 = vmul.f32 %v822_v0, %v229_v22  ;;  %v231_v33 = vld [vmem:[%s828_s23 + $0x40] sm:$0xff] }
  0x13   : > { %v493_v24 = vadd.f32 %v429_v5, %v365_v12  ;;  %v494_v25 = vadd.f32 %v430_v8, %v366_v13  ;;  %v369_v27 = vadd.f32 %v840_v2, %v298_v17  ;;  %v495_v29 = vadd.f32 %v431_v14, %v367_v19  ;;  %v232_v34 = vld [vmem:[%s828_s23 + $0x48] sm:$0xff]  ;;  %v435_v39 = vld [vmem:[%s834_s26 + $0x30] sm:$0xff]  ;;  %v436_v40 = vld [vmem:[%s834_s26 + $0x38] sm:$0xff] }
  0x14   : > { %v370_v30 = vadd.f32 %v840_v2, %v299_v21  ;;  %v301_v32 = vmul.f32 %v822_v0, %v230_v23  ;;  %v496_v37 = vadd.f32 %v432_v16, %v368_v26  ;;  %v233_v41 = vld [vmem:[%s828_s23 + $0x50] sm:$0xff]  ;;  %v371_v44 = vadd.f32 %v840_v2, %v300_v31  ;;  %v234_v46 = vld [vmem:[%s828_s23 + $0x58] sm:$0xff]  ;;  %v235_v47 = vld [vmem:[%s828_s23 + $0x60] sm:$0xff] }
  0x15   : > { %v557_v35 = vmax.f32 %v493_v24, 0.0  ;;  %v558_v36 = vmax.f32 %v494_v25, 0.0  ;;  %v497_v38 = vadd.f32 %v433_v20, %v369_v27  ;;  %v559_v42 = vmax.f32 %v495_v29, 0.0  ;;  %v236_v52 = vld [vmem:[%s828_s23 + $0x68] sm:$0xff]  ;;  %v437_v56 = vld [vmem:[%s834_s26 + $0x40] sm:$0xff]  ;;  %v439_v61 = vld [vmem:[%s834_s26 + $0x50] sm:$0xff] }
  0x16   : > { %v498_v43 = vadd.f32 %v434_v28, %v370_v30  ;;  %v372_v45 = vadd.f32 %v840_v2, %v301_v32  ;;  %v560_v48 = vmax.f32 %v496_v37, 0.0  ;;  %v302_v50 = vmul.f32 %v822_v0, %v231_v33  ;;  %v438_v57 = vld [vmem:[%s834_s26 + $0x48] sm:$0xff]  ;;  %v237_v1 = vld [vmem:[%s828_s23 + $0x70] sm:$0xff]  ;;  %v238_v3 = vld [vmem:[%s828_s23 + $0x78] sm:$0xff] }
  0x17   : > { %621 = vst [vmem:[%s870_s5] sm:$0xff] %v557_v35  ;;  %622 = vst [vmem:[%s870_s5 + $0x8] sm:$0xff] %v558_v36  ;;  %v561_v49 = vmax.f32 %v497_v38, 0.0  ;;  %v303_v51 = vmul.f32 %v822_v0, %v232_v34  ;;  %v499_v54 = vadd.f32 %v435_v39, %v371_v44  ;;  %v304_v58 = vmul.f32 %v822_v0, %v233_v41  ;;  %v440_v7 = vld [vmem:[%s834_s26 + $0x58] sm:$0xff]  ;;  %v441_v8 = vld [vmem:[%s834_s26 + $0x60] sm:$0xff] }
  0x18   : > { %623 = vst [vmem:[%s870_s5 + $0x10] sm:$0xff] %v559_v42  ;;  %v562_v53 = vmax.f32 %v498_v43, 0.0  ;;  %v500_v55 = vadd.f32 %v436_v40, %v372_v45  ;;  %624 = vst [vmem:[%s870_s5 + $0x18] sm:$0xff] %v560_v48  ;;  %v373_v59 = vadd.f32 %v840_v2, %v302_v50  ;;  %v305_v62 = vmul.f32 %v822_v0, %v234_v46  ;;  %v442_v14 = vld [vmem:[%s834_s26 + $0x68] sm:$0xff]  ;;  %v239_v19 = vld [vmem:[%s828_s23 + $0x80] sm:$0xff] }
  0x19   : > { %625 = vst [vmem:[%s870_s5 + $0x20] sm:$0xff] %v561_v49  ;;  %v374_v60 = vadd.f32 %v840_v2, %v303_v51  ;;  %v306_v63 = vmul.f32 %v822_v0, %v235_v47  ;;  %v563_v4 = vmax.f32 %v499_v54, 0.0  ;;  %v375_v6 = vadd.f32 %v840_v2, %v304_v58  ;;  %v240_v20 = vld [vmem:[%s828_s23 + $0x88] sm:$0xff]  ;;  %v443_v25 = vld [vmem:[%s834_s26 + $0x70] sm:$0xff]  ;;  %v444_v26 = vld [vmem:[%s834_s26 + $0x78] sm:$0xff] }
  0x1a   : > { %626 = vst [vmem:[%s870_s5 + $0x28] sm:$0xff] %v562_v53  ;;  %v564_v5 = vmax.f32 %v500_v55, 0.0  ;;  %v307_v9 = vmul.f32 %v822_v0, %v236_v52  ;;  %v501_v10 = vadd.f32 %v437_v56, %v373_v59  ;;  %v376_v12 = vadd.f32 %v840_v2, %v305_v62  ;;  %v241_v27 = vld [vmem:[%s828_s23 + $0x90] sm:$0xff]  ;;  %v242_v32 = vld [vmem:[%s828_s23 + $0x98] sm:$0xff]  ;;  %v243_v33 = vld [vmem:[%s828_s23 + $0xa0] sm:$0xff] }
  0x1b   : > { %v502_v11 = vadd.f32 %v438_v57, %v374_v60  ;;  %v377_v13 = vadd.f32 %v840_v2, %v306_v63  ;;  %627 = vst [vmem:[%s870_s5 + $0x30] sm:$0xff] %v563_v4  ;;  %v503_v15 = vadd.f32 %v439_v61, %v375_v6  ;;  %v308_v17 = vmul.f32 %v822_v0, %v237_v1  ;;  %v244_v38 = vld [vmem:[%s828_s23 + $0xa8] sm:$0xff]  ;;  %v445_v42 = vld [vmem:[%s834_s26 + $0x80] sm:$0xff]  ;;  %v447_v47 = vld [vmem:[%s834_s26 + $0x90] sm:$0xff] }
  0x1c   : > { %628 = vst [vmem:[%s870_s5 + $0x38] sm:$0xff] %v564_v5  ;;  %v378_v16 = vadd.f32 %v840_v2, %v307_v9  ;;  %v309_v18 = vmul.f32 %v822_v0, %v238_v3  ;;  %v565_v21 = vmax.f32 %v501_v10, 0.0  ;;  %v504_v23 = vadd.f32 %v440_v7, %v376_v12  ;;  %v446_v43 = vld [vmem:[%s834_s26 + $0x88] sm:$0xff]  ;;  %v245_v50 = vld [vmem:[%s828_s23 + $0xb0] sm:$0xff]  ;;  %v246_v51 = vld [vmem:[%s828_s23 + $0xb8] sm:$0xff] }
  0x1d   : > { %v566_v22 = vmax.f32 %v502_v11, 0.0  ;;  %v505_v24 = vadd.f32 %v441_v8, %v377_v13  ;;  %v567_v28 = vmax.f32 %v503_v15, 0.0  ;;  %v379_v30 = vadd.f32 %v840_v2, %v308_v17  ;;  %v448_v55 = vld [vmem:[%s834_s26 + $0x98] sm:$0xff]  ;;  %v449_v56 = vld [vmem:[%s834_s26 + $0xa0] sm:$0xff]  ;;  %v450_v62 = vld [vmem:[%s834_s26 + $0xa8] sm:$0xff] }
  0x1e   : > { %v506_v29 = vadd.f32 %v442_v14, %v378_v16  ;;  %v380_v31 = vadd.f32 %v840_v2, %v309_v18  ;;  %629 = vst [vmem:[%s870_s5 + $0x40] sm:$0xff] %v565_v21  ;;  %v568_v34 = vmax.f32 %v504_v23, 0.0  ;;  %v310_v36 = vmul.f32 %v822_v0, %v239_v19  ;;  %v247_v5 = vld [vmem:[%s828_s23 + $0xc0] sm:$0xff]  ;;  %v248_v6 = vld [vmem:[%s828_s23 + $0xc8] sm:$0xff]  ;;  %v451_v11 = vld [vmem:[%s834_s26 + $0xb0] sm:$0xff] }
  0x1f   : > { %630 = vst [vmem:[%s870_s5 + $0x48] sm:$0xff] %v566_v22  ;;  %v569_v35 = vmax.f32 %v505_v24, 0.0  ;;  %v311_v37 = vmul.f32 %v822_v0, %v240_v20  ;;  %631 = vst [vmem:[%s870_s5 + $0x50] sm:$0xff] %v567_v28  ;;  %v507_v40 = vadd.f32 %v443_v25, %v379_v30  ;;  %v312_v44 = vmul.f32 %v822_v0, %v241_v27  ;;  %v452_v12 = vld [vmem:[%s834_s26 + $0xb8] sm:$0xff]  ;;  %v249_v13 = vld [vmem:[%s828_s23 + $0xd0] sm:$0xff] }
  0x20   : > { %v570_v39 = vmax.f32 %v506_v29, 0.0  ;;  %v508_v41 = vadd.f32 %v444_v26, %v380_v31  ;;  %632 = vst [vmem:[%s870_s5 + $0x58] sm:$0xff] %v568_v34  ;;  %v381_v45 = vadd.f32 %v840_v2, %v310_v36  ;;  %v313_v48 = vmul.f32 %v822_v0, %v242_v32  ;;  %v250_v18 = vld [vmem:[%s828_s23 + $0xd8] sm:$0xff]  ;;  %v251_v19 = vld [vmem:[%s828_s23 + $0xe0] sm:$0xff]  ;;  %v252_v24 = vld [vmem:[%s828_s23 + $0xe8] sm:$0xff] }
  0x21   : > { %633 = vst [vmem:[%s870_s5 + $0x60] sm:$0xff] %v569_v35  ;;  %v382_v46 = vadd.f32 %v840_v2, %v311_v37  ;;  %v314_v49 = vmul.f32 %v822_v0, %v243_v33  ;;  %v571_v52 = vmax.f32 %v507_v40, 0.0  ;;  %v383_v54 = vadd.f32 %v840_v2, %v312_v44  ;;  %v453_v28 = vld [vmem:[%s834_s26 + $0xc0] sm:$0xff]  ;;  %v454_v29 = vld [vmem:[%s834_s26 + $0xc8] sm:$0xff]  ;;  %v455_v33 = vld [vmem:[%s834_s26 + $0xd0] sm:$0xff] }
  0x22   : > { %634 = vst [vmem:[%s870_s5 + $0x68] sm:$0xff] %v570_v39  ;;  %v572_v53 = vmax.f32 %v508_v41, 0.0  ;;  %v315_v57 = vmul.f32 %v822_v0, %v244_v38  ;;  %v509_v58 = vadd.f32 %v445_v42, %v381_v45  ;;  %v384_v60 = vadd.f32 %v840_v2, %v313_v48  ;;  %v253_v36 = vld [vmem:[%s828_s23 + $0xf0] sm:$0xff]  ;;  %v254_v37 = vld [vmem:[%s828_s23 + $0xf8] sm:$0xff]  ;;  %v457_v42 = vld [vmem:[%s834_s26 + $0xe0] sm:$0xff] }
  0x23   : > { %v510_v59 = vadd.f32 %v446_v43, %v382_v46  ;;  %v385_v61 = vadd.f32 %v840_v2, %v314_v49  ;;  %635 = vst [vmem:[%s870_s5 + $0x70] sm:$0xff] %v571_v52  ;;  %v511_v63 = vadd.f32 %v447_v47, %v383_v54  ;;  %v316_v3 = vmul.f32 %v822_v0, %v245_v50  ;;  %v456_v41 = vld [vmem:[%s834_s26 + $0xd8] sm:$0xff]  ;;  %v458_v48 = vld [vmem:[%s834_s26 + $0xe8] sm:$0xff] }
  0x24   : > { %636 = vst [vmem:[%s870_s5 + $0x78] sm:$0xff] %v572_v53  ;;  %v386_v1 = vadd.f32 %v840_v2, %v315_v57  ;;  %v317_v4 = vmul.f32 %v822_v0, %v246_v51  ;;  %v573_v7 = vmax.f32 %v509_v58, 0.0  ;;  %v512_v9 = vadd.f32 %v448_v55, %v384_v60  ;;  %v255_v53 = vld [vmem:[%s828_s23 + $0x100] sm:$0xff]  ;;  %v256_v54 = vld [vmem:[%s828_s23 + $0x108] sm:$0xff]  ;;  %v460_v60 = vld [vmem:[%s834_s26 + $0xf8] sm:$0xff] }
  0x25   : > { %v574_v8 = vmax.f32 %v510_v59, 0.0  ;;  %v513_v10 = vadd.f32 %v449_v56, %v385_v61  ;;  %v575_v14 = vmax.f32 %v511_v63, 0.0  ;;  %v387_v16 = vadd.f32 %v840_v2, %v316_v3  ;;  %v459_v59 = vld [vmem:[%s834_s26 + $0xf0] sm:$0xff] }
  0x26   : > { %v514_v15 = vadd.f32 %v450_v62, %v386_v1  ;;  %v388_v17 = vadd.f32 %v840_v2, %v317_v4  ;;  %637 = vst [vmem:[%s870_s5 + $0x80] sm:$0xff] %v573_v7  ;;  %v576_v20 = vmax.f32 %v512_v9, 0.0  ;;  %v318_v22 = vmul.f32 %v822_v0, %v247_v5  ;;  %v257_v61 = vld [vmem:[%s828_s23 + $0x110] sm:$0xff]  ;;  %v258_v4 = vld [vmem:[%s828_s23 + $0x118] sm:$0xff]  ;;  %v259_v5 = vld [vmem:[%s828_s23 + $0x120] sm:$0xff] }
  0x27   : > { %638 = vst [vmem:[%s870_s5 + $0x88] sm:$0xff] %v574_v8  ;;  %v577_v21 = vmax.f32 %v513_v10, 0.0  ;;  %v319_v23 = vmul.f32 %v822_v0, %v248_v6  ;;  %639 = vst [vmem:[%s870_s5 + $0x90] sm:$0xff] %v575_v14  ;;  %v515_v26 = vadd.f32 %v451_v11, %v387_v16  ;;  %v320_v30 = vmul.f32 %v822_v0, %v249_v13  ;;  %v260_v10 = vld [vmem:[%s828_s23 + $0x128] sm:$0xff]  ;;  %v461_v14 = vld [vmem:[%s834_s26 + $0x100] sm:$0xff] }
  0x28   : > { %v578_v25 = vmax.f32 %v514_v15, 0.0  ;;  %v516_v27 = vadd.f32 %v452_v12, %v388_v17  ;;  %640 = vst [vmem:[%s870_s5 + $0x98] sm:$0xff] %v576_v20  ;;  %v389_v31 = vadd.f32 %v840_v2, %v318_v22  ;;  %v321_v34 = vmul.f32 %v822_v0, %v250_v18  ;;  %v462_v15 = vld [vmem:[%s834_s26 + $0x108] sm:$0xff]  ;;  %v261_v22 = vld [vmem:[%s828_s23 + $0x130] sm:$0xff] }
  0x29   : > { %641 = vst [vmem:[%s870_s5 + $0xa0] sm:$0xff] %v577_v21  ;;  %v390_v32 = vadd.f32 %v840_v2, %v319_v23  ;;  %v322_v35 = vmul.f32 %v822_v0, %v251_v19  ;;  %v579_v38 = vmax.f32 %v515_v26, 0.0  ;;  %v391_v40 = vadd.f32 %v840_v2, %v320_v30  ;;  %v463_v19 = vld [vmem:[%s834_s26 + $0x110] sm:$0xff]  ;;  %v262_v23 = vld [vmem:[%s828_s23 + $0x138] sm:$0xff] }
  0x2a   : > { %642 = vst [vmem:[%s870_s5 + $0xa8] sm:$0xff] %v578_v25  ;;  %v580_v39 = vmax.f32 %v516_v27, 0.0  ;;  %v323_v43 = vmul.f32 %v822_v0, %v252_v24  ;;  %v517_v44 = vadd.f32 %v453_v28, %v389_v31  ;;  %v392_v46 = vadd.f32 %v840_v2, %v321_v34  ;;  %v464_v27 = vld [vmem:[%s834_s26 + $0x118] sm:$0xff]  ;;  %v465_v28 = vld [vmem:[%s834_s26 + $0x120] sm:$0xff]  ;;  %v466_v34 = vld [vmem:[%s834_s26 + $0x128] sm:$0xff] }
  0x2b   : > { %v518_v45 = vadd.f32 %v454_v29, %v390_v32  ;;  %v393_v47 = vadd.f32 %v840_v2, %v322_v35  ;;  %643 = vst [vmem:[%s870_s5 + $0xb0] sm:$0xff] %v579_v38  ;;  %v519_v49 = vadd.f32 %v455_v33, %v391_v40  ;;  %v324_v51 = vmul.f32 %v822_v0, %v253_v36  ;;  %v264_v40 = vld [vmem:[%s828_s23 + $0x148] sm:$0xff] }
  0x2c   : > { %644 = vst [vmem:[%s870_s5 + $0xb8] sm:$0xff] %v580_v39  ;;  %v394_v50 = vadd.f32 %v840_v2, %v323_v43  ;;  %v325_v52 = vmul.f32 %v822_v0, %v254_v37  ;;  %v581_v55 = vmax.f32 %v517_v44, 0.0  ;;  %v520_v57 = vadd.f32 %v456_v41, %v392_v46  ;;  %v263_v39 = vld [vmem:[%s828_s23 + $0x140] sm:$0xff]  ;;  %v468_v46 = vld [vmem:[%s834_s26 + $0x138] sm:$0xff] }
  0x2d   : > { %v582_v56 = vmax.f32 %v518_v45, 0.0  ;;  %v521_v58 = vadd.f32 %v457_v42, %v393_v47  ;;  %v583_v62 = vmax.f32 %v519_v49, 0.0  ;;  %v395_v1 = vadd.f32 %v840_v2, %v324_v51  ;;  %v467_v45 = vld [vmem:[%s834_s26 + $0x130] sm:$0xff] }
  0x2e   : > { %v522_v63 = vadd.f32 %v458_v48, %v394_v50  ;;  %v396_v3 = vadd.f32 %v840_v2, %v325_v52  ;;  %645 = vst [vmem:[%s870_s5 + $0xc0] sm:$0xff] %v581_v55  ;;  %v584_v6 = vmax.f32 %v520_v57, 0.0  ;;  %v326_v8 = vmul.f32 %v822_v0, %v255_v53  ;;  %v265_v47 = vld [vmem:[%s828_s23 + $0x150] sm:$0xff]  ;;  %v266_v52 = vld [vmem:[%s828_s23 + $0x158] sm:$0xff]  ;;  %v267_v53 = vld [vmem:[%s828_s23 + $0x160] sm:$0xff] }
  0x2f   : > { %646 = vst [vmem:[%s870_s5 + $0xc8] sm:$0xff] %v582_v56  ;;  %v585_v7 = vmax.f32 %v521_v58, 0.0  ;;  %v327_v9 = vmul.f32 %v822_v0, %v256_v54  ;;  %647 = vst [vmem:[%s870_s5 + $0xd0] sm:$0xff] %v583_v62  ;;  %v523_v12 = vadd.f32 %v459_v59, %v395_v1  ;;  %v328_v16 = vmul.f32 %v822_v0, %v257_v61  ;;  %v268_v58 = vld [vmem:[%s828_s23 + $0x168] sm:$0xff]  ;;  %v469_v62 = vld [vmem:[%s834_s26 + $0x140] sm:$0xff] }
  0x30   : > { %v586_v11 = vmax.f32 %v522_v63, 0.0  ;;  %v524_v13 = vadd.f32 %v460_v60, %v396_v3  ;;  %648 = vst [vmem:[%s870_s5 + $0xd8] sm:$0xff] %v584_v6  ;;  %v397_v17 = vadd.f32 %v840_v2, %v326_v8  ;;  %v329_v20 = vmul.f32 %v822_v0, %v258_v4  ;;  %v470_v63 = vld [vmem:[%s834_s26 + $0x148] sm:$0xff]  ;;  %v269_v8 = vld [vmem:[%s828_s23 + $0x170] sm:$0xff] }
  0x31   : > { %649 = vst [vmem:[%s870_s5 + $0xe0] sm:$0xff] %v585_v7  ;;  %v398_v18 = vadd.f32 %v840_v2, %v327_v9  ;;  %v330_v21 = vmul.f32 %v822_v0, %v259_v5  ;;  %v587_v24 = vmax.f32 %v523_v12, 0.0  ;;  %v399_v26 = vadd.f32 %v840_v2, %v328_v16  ;;  %v471_v5 = vld [vmem:[%s834_s26 + $0x150] sm:$0xff]  ;;  %v270_v9 = vld [vmem:[%s828_s23 + $0x178] sm:$0xff] }
  0x32   : > { %650 = vst [vmem:[%s870_s5 + $0xe8] sm:$0xff] %v586_v11  ;;  %v588_v25 = vmax.f32 %v524_v13, 0.0  ;;  %v331_v29 = vmul.f32 %v822_v0, %v260_v10  ;;  %v525_v30 = vadd.f32 %v461_v14, %v397_v17  ;;  %v400_v32 = vadd.f32 %v840_v2, %v329_v20  ;;  %v472_v13 = vld [vmem:[%s834_s26 + $0x158] sm:$0xff]  ;;  %v473_v14 = vld [vmem:[%s834_s26 + $0x160] sm:$0xff]  ;;  %v474_v20 = vld [vmem:[%s834_s26 + $0x168] sm:$0xff] }
  0x33   : > { %v526_v31 = vadd.f32 %v462_v15, %v398_v18  ;;  %v401_v33 = vadd.f32 %v840_v2, %v330_v21  ;;  %651 = vst [vmem:[%s870_s5 + $0xf0] sm:$0xff] %v587_v24  ;;  %v527_v35 = vadd.f32 %v463_v19, %v399_v26  ;;  %v332_v37 = vmul.f32 %v822_v0, %v261_v22  ;;  %v272_v26 = vld [vmem:[%s828_s23 + $0x188] sm:$0xff] }
  0x34   : > { %652 = vst [vmem:[%s870_s5 + $0xf8] sm:$0xff] %v588_v25  ;;  %v402_v36 = vadd.f32 %v840_v2, %v331_v29  ;;  %v333_v38 = vmul.f32 %v822_v0, %v262_v23  ;;  %v589_v41 = vmax.f32 %v525_v30, 0.0  ;;  %v528_v43 = vadd.f32 %v464_v27, %v400_v32  ;;  %v271_v25 = vld [vmem:[%s828_s23 + $0x180] sm:$0xff]  ;;  %v476_v32 = vld [vmem:[%s834_s26 + $0x178] sm:$0xff] }
  0x35   : > { %v590_v42 = vmax.f32 %v526_v31, 0.0  ;;  %v529_v44 = vadd.f32 %v465_v28, %v401_v33  ;;  %v591_v48 = vmax.f32 %v527_v35, 0.0  ;;  %v403_v50 = vadd.f32 %v840_v2, %v332_v37  ;;  %v475_v31 = vld [vmem:[%s834_s26 + $0x170] sm:$0xff] }
  0x36   : > { %v530_v49 = vadd.f32 %v466_v34, %v402_v36  ;;  %v404_v51 = vadd.f32 %v840_v2, %v333_v38  ;;  %653 = vst [vmem:[%s870_s5 + $0x100] sm:$0xff] %v589_v41  ;;  %v592_v54 = vmax.f32 %v528_v43, 0.0  ;;  %v334_v56 = vmul.f32 %v822_v0, %v263_v39  ;;  %v273_v33 = vld [vmem:[%s828_s23 + $0x190] sm:$0xff]  ;;  %v274_v38 = vld [vmem:[%s828_s23 + $0x198] sm:$0xff]  ;;  %v275_v39 = vld [vmem:[%s828_s23 + $0x1a0] sm:$0xff] }
  0x37   : > { %654 = vst [vmem:[%s870_s5 + $0x108] sm:$0xff] %v590_v42  ;;  %v593_v55 = vmax.f32 %v529_v44, 0.0  ;;  %v335_v57 = vmul.f32 %v822_v0, %v264_v40  ;;  %655 = vst [vmem:[%s870_s5 + $0x110] sm:$0xff] %v591_v48  ;;  %v531_v60 = vadd.f32 %v467_v45, %v403_v50  ;;  %v336_v1 = vmul.f32 %v822_v0, %v265_v47  ;;  %v276_v44 = vld [vmem:[%s828_s23 + $0x1a8] sm:$0xff]  ;;  %v477_v48 = vld [vmem:[%s834_s26 + $0x180] sm:$0xff] }
  0x38   : > { %v594_v59 = vmax.f32 %v530_v49, 0.0  ;;  %v532_v61 = vadd.f32 %v468_v46, %v404_v51  ;;  %656 = vst [vmem:[%s870_s5 + $0x118] sm:$0xff] %v592_v54  ;;  %v405_v3 = vadd.f32 %v840_v2, %v334_v56  ;;  %v337_v6 = vmul.f32 %v822_v0, %v266_v52  ;;  %v478_v49 = vld [vmem:[%s834_s26 + $0x188] sm:$0xff]  ;;  %v277_v56 = vld [vmem:[%s828_s23 + $0x1b0] sm:$0xff] }
  0x39   : > { %657 = vst [vmem:[%s870_s5 + $0x120] sm:$0xff] %v593_v55  ;;  %v406_v4 = vadd.f32 %v840_v2, %v335_v57  ;;  %v338_v7 = vmul.f32 %v822_v0, %v267_v53  ;;  %v595_v10 = vmax.f32 %v531_v60, 0.0  ;;  %v407_v12 = vadd.f32 %v840_v2, %v336_v1  ;;  %v479_v53 = vld [vmem:[%s834_s26 + $0x190] sm:$0xff]  ;;  %v278_v57 = vld [vmem:[%s828_s23 + $0x1b8] sm:$0xff] }
  0x3a   : > { %658 = vst [vmem:[%s870_s5 + $0x128] sm:$0xff] %v594_v59  ;;  %v596_v11 = vmax.f32 %v532_v61, 0.0  ;;  %v339_v15 = vmul.f32 %v822_v0, %v268_v58  ;;  %v533_v16 = vadd.f32 %v469_v62, %v405_v3  ;;  %v408_v18 = vadd.f32 %v840_v2, %v337_v6  ;;  %v480_v61 = vld [vmem:[%s834_s26 + $0x198] sm:$0xff]  ;;  %v481_v62 = vld [vmem:[%s834_s26 + $0x1a0] sm:$0xff]  ;;  %v482_v6 = vld [vmem:[%s834_s26 + $0x1a8] sm:$0xff] }
  0x3b   : > { %v534_v17 = vadd.f32 %v470_v63, %v406_v4  ;;  %v409_v19 = vadd.f32 %v840_v2, %v338_v7  ;;  %659 = vst [vmem:[%s870_s5 + $0x130] sm:$0xff] %v595_v10  ;;  %v535_v21 = vadd.f32 %v471_v5, %v407_v12  ;;  %v340_v23 = vmul.f32 %v822_v0, %v269_v8  ;;  %v280_v12 = vld [vmem:[%s828_s23 + $0x1c8] sm:$0xff] }
  0x3c   : > { %660 = vst [vmem:[%s870_s5 + $0x138] sm:$0xff] %v596_v11  ;;  %v410_v22 = vadd.f32 %v840_v2, %v339_v15  ;;  %v341_v24 = vmul.f32 %v822_v0, %v270_v9  ;;  %v597_v27 = vmax.f32 %v533_v16, 0.0  ;;  %v536_v29 = vadd.f32 %v472_v13, %v408_v18  ;;  %v279_v11 = vld [vmem:[%s828_s23 + $0x1c0] sm:$0xff]  ;;  %v484_v18 = vld [vmem:[%s834_s26 + $0x1b8] sm:$0xff] }
  0x3d   : > { %v598_v28 = vmax.f32 %v534_v17, 0.0  ;;  %v537_v30 = vadd.f32 %v473_v14, %v409_v19  ;;  %v599_v34 = vmax.f32 %v535_v21, 0.0  ;;  %v411_v36 = vadd.f32 %v840_v2, %v340_v23  ;;  %v483_v17 = vld [vmem:[%s834_s26 + $0x1b0] sm:$0xff] }
  0x3e   : > { %v538_v35 = vadd.f32 %v474_v20, %v410_v22  ;;  %v412_v37 = vadd.f32 %v840_v2, %v341_v24  ;;  %661 = vst [vmem:[%s870_s5 + $0x140] sm:$0xff] %v597_v27  ;;  %v600_v40 = vmax.f32 %v536_v29, 0.0  ;;  %v342_v42 = vmul.f32 %v822_v0, %v271_v25  ;;  %v281_v19 = vld [vmem:[%s828_s23 + $0x1d0] sm:$0xff]  ;;  %v282_v24 = vld [vmem:[%s828_s23 + $0x1d8] sm:$0xff]  ;;  %v283_v25 = vld [vmem:[%s828_s23 + $0x1e0] sm:$0xff] }
  0x3f   : > { %662 = vst [vmem:[%s870_s5 + $0x148] sm:$0xff] %v598_v28  ;;  %v601_v41 = vmax.f32 %v537_v30, 0.0  ;;  %v343_v43 = vmul.f32 %v822_v0, %v272_v26  ;;  %663 = vst [vmem:[%s870_s5 + $0x150] sm:$0xff] %v599_v34  ;;  %v539_v46 = vadd.f32 %v475_v31, %v411_v36  ;;  %v344_v50 = vmul.f32 %v822_v0, %v273_v33  ;;  %v284_v30 = vld [vmem:[%s828_s23 + $0x1e8] sm:$0xff]  ;;  %v485_v34 = vld [vmem:[%s834_s26 + $0x1c0] sm:$0xff] }
  0x40   : > { %v602_v45 = vmax.f32 %v538_v35, 0.0  ;;  %v540_v47 = vadd.f32 %v476_v32, %v412_v37  ;;  %664 = vst [vmem:[%s870_s5 + $0x158] sm:$0xff] %v600_v40  ;;  %v413_v51 = vadd.f32 %v840_v2, %v342_v42  ;;  %v345_v54 = vmul.f32 %v822_v0, %v274_v38  ;;  %v486_v35 = vld [vmem:[%s834_s26 + $0x1c8] sm:$0xff]  ;;  %v285_v42 = vld [vmem:[%s828_s23 + $0x1f0] sm:$0xff] }
  0x41   : > { %665 = vst [vmem:[%s870_s5 + $0x160] sm:$0xff] %v601_v41  ;;  %v414_v52 = vadd.f32 %v840_v2, %v343_v43  ;;  %v346_v55 = vmul.f32 %v822_v0, %v275_v39  ;;  %v603_v58 = vmax.f32 %v539_v46, 0.0  ;;  %v415_v60 = vadd.f32 %v840_v2, %v344_v50  ;;  %v487_v39 = vld [vmem:[%s834_s26 + $0x1d0] sm:$0xff]  ;;  %v286_v43 = vld [vmem:[%s828_s23 + $0x1f8] sm:$0xff] }
  0x42   : > { %666 = vst [vmem:[%s870_s5 + $0x168] sm:$0xff] %v602_v45  ;;  %v604_v59 = vmax.f32 %v540_v47, 0.0  ;;  %v347_v63 = vmul.f32 %v822_v0, %v276_v44  ;;  %v541_v1 = vadd.f32 %v477_v48, %v413_v51  ;;  %v416_v4 = vadd.f32 %v840_v2, %v345_v54  ;;  %v488_v47 = vld [vmem:[%s834_s26 + $0x1d8] sm:$0xff]  ;;  %v489_v48 = vld [vmem:[%s834_s26 + $0x1e0] sm:$0xff]  ;;  %v490_v54 = vld [vmem:[%s834_s26 + $0x1e8] sm:$0xff] }
  0x43   : > { %v542_v3 = vadd.f32 %v478_v49, %v414_v52  ;;  %v417_v5 = vadd.f32 %v840_v2, %v346_v55  ;;  %667 = vst [vmem:[%s870_s5 + $0x170] sm:$0xff] %v603_v58  ;;  %v543_v7 = vadd.f32 %v479_v53, %v415_v60  ;;  %v348_v9 = vmul.f32 %v822_v0, %v277_v56 }
  0x44   : > { %668 = vst [vmem:[%s870_s5 + $0x178] sm:$0xff] %v604_v59  ;;  %v418_v8 = vadd.f32 %v840_v2, %v347_v63  ;;  %v349_v10 = vmul.f32 %v822_v0, %v278_v57  ;;  %v605_v13 = vmax.f32 %v541_v1, 0.0  ;;  %v544_v15 = vadd.f32 %v480_v61, %v416_v4  ;;  %v491_v63 = vld [vmem:[%s834_s26 + $0x1f0] sm:$0xff]  ;;  %v492_v1 = vld [vmem:[%s834_s26 + $0x1f8] sm:$0xff] }
  0x45   : > { %v606_v14 = vmax.f32 %v542_v3, 0.0  ;;  %v545_v16 = vadd.f32 %v481_v62, %v417_v5  ;;  %v607_v20 = vmax.f32 %v543_v7, 0.0  ;;  %v419_v22 = vadd.f32 %v840_v2, %v348_v9 }
  0x46   : > { %v546_v21 = vadd.f32 %v482_v6, %v418_v8  ;;  %v420_v23 = vadd.f32 %v840_v2, %v349_v10  ;;  %669 = vst [vmem:[%s870_s5 + $0x180] sm:$0xff] %v605_v13  ;;  %v608_v26 = vmax.f32 %v544_v15, 0.0  ;;  %v350_v28 = vmul.f32 %v822_v0, %v279_v11 }
  0x47   : > { %670 = vst [vmem:[%s870_s5 + $0x188] sm:$0xff] %v606_v14  ;;  %v609_v27 = vmax.f32 %v545_v16, 0.0  ;;  %v351_v29 = vmul.f32 %v822_v0, %v280_v12  ;;  %671 = vst [vmem:[%s870_s5 + $0x190] sm:$0xff] %v607_v20  ;;  %v547_v32 = vadd.f32 %v483_v17, %v419_v22  ;;  %v352_v36 = vmul.f32 %v822_v0, %v281_v19 }
  0x48   : > { %v610_v31 = vmax.f32 %v546_v21, 0.0  ;;  %v548_v33 = vadd.f32 %v484_v18, %v420_v23  ;;  %672 = vst [vmem:[%s870_s5 + $0x198] sm:$0xff] %v608_v26  ;;  %v421_v37 = vadd.f32 %v840_v2, %v350_v28  ;;  %v353_v40 = vmul.f32 %v822_v0, %v282_v24 }
  0x49   : > { %673 = vst [vmem:[%s870_s5 + $0x1a0] sm:$0xff] %v609_v27  ;;  %v422_v38 = vadd.f32 %v840_v2, %v351_v29  ;;  %v354_v41 = vmul.f32 %v822_v0, %v283_v25  ;;  %v611_v44 = vmax.f32 %v547_v32, 0.0  ;;  %v423_v46 = vadd.f32 %v840_v2, %v352_v36 }
  0x4a   : > { %674 = vst [vmem:[%s870_s5 + $0x1a8] sm:$0xff] %v610_v31  ;;  %v612_v45 = vmax.f32 %v548_v33, 0.0  ;;  %v355_v49 = vmul.f32 %v822_v0, %v284_v30  ;;  %v549_v50 = vadd.f32 %v485_v34, %v421_v37  ;;  %v424_v52 = vadd.f32 %v840_v2, %v353_v40 }
  0x4b   : > { %v550_v51 = vadd.f32 %v486_v35, %v422_v38  ;;  %v425_v53 = vadd.f32 %v840_v2, %v354_v41  ;;  %675 = vst [vmem:[%s870_s5 + $0x1b0] sm:$0xff] %v611_v44  ;;  %v551_v55 = vadd.f32 %v487_v39, %v423_v46  ;;  %v356_v57 = vmul.f32 %v822_v0, %v285_v42 }
  0x4c   : > { %676 = vst [vmem:[%s870_s5 + $0x1b8] sm:$0xff] %v612_v45  ;;  %v426_v56 = vadd.f32 %v840_v2, %v355_v49  ;;  %v357_v58 = vmul.f32 %v822_v0, %v286_v43  ;;  %v613_v59 = vmax.f32 %v549_v50, 0.0  ;;  %v552_v61 = vadd.f32 %v488_v47, %v424_v52 }
  0x4d   : > { %v614_v60 = vmax.f32 %v550_v51, 0.0  ;;  %v553_v62 = vadd.f32 %v489_v48, %v425_v53  ;;  %v615_v3 = vmax.f32 %v551_v55, 0.0  ;;  %v427_v5 = vadd.f32 %v840_v2, %v356_v57 }
  0x4e   : > { %v554_v4 = vadd.f32 %v490_v54, %v426_v56  ;;  %v428_v6 = vadd.f32 %v840_v2, %v357_v58  ;;  %677 = vst [vmem:[%s870_s5 + $0x1c0] sm:$0xff] %v613_v59  ;;  %v616_v0 = vmax.f32 %v552_v61, 0.0 }
  0x4f   : > { %678 = vst [vmem:[%s870_s5 + $0x1c8] sm:$0xff] %v614_v60  ;;  %v617_v7 = vmax.f32 %v553_v62, 0.0  ;;  %679 = vst [vmem:[%s870_s5 + $0x1d0] sm:$0xff] %v615_v3  ;;  %v555_v9 = vadd.f32 %v491_v63, %v427_v5 }
  0x50   : > { %v618_v8 = vmax.f32 %v554_v4, 0.0  ;;  %v556_v10 = vadd.f32 %v492_v1, %v428_v6  ;;  %680 = vst [vmem:[%s870_s5 + $0x1d8] sm:$0xff] %v616_v0 }
  0x51   : > { %681 = vst [vmem:[%s870_s5 + $0x1e0] sm:$0xff] %v617_v7  ;;  %v619_v11 = vmax.f32 %v555_v9, 0.0 }
  0x52   : > { %682 = vst [vmem:[%s870_s5 + $0x1e8] sm:$0xff] %v618_v8  ;;  %v620_v12 = vmax.f32 %v556_v10, 0.0 }
  0x53   : > { %683 = vst [vmem:[%s870_s5 + $0x1f0] sm:$0xff] %v619_v11 }
  0x54   : > { %684 = vst [vmem:[%s870_s5 + $0x1f8] sm:$0xff] %v620_v12 }
  0x55 PF: > { %s14_s15 = sadd.s32 1, %s782_s15  }
  0x56   : > { %p11_p4 = scmp.ge.s32.totalorder %s14_s15, 4  }
  0x58   :  { %13 = sbr.rel (!%p11_p4) target bundleno = 1 (0x1), region = 69 }

</bundles_post_ra>
